<compile_context>
chip_gen: v7x
topology: tpu7x:2x2x1
jax: 0.10.0
libtpu: 0.0.40
codegen_flags: <defaults>
</compile_context>

<pallas_src>
import functools

import jax
import jax.numpy as jnp
from jax.experimental import pallas as pl
from jax.experimental.pallas import tpu as pltpu


# ----------------------------------------------------------------------------
# Kernel: whole forward for one image (one grid program), lane-dense layout
# ----------------------------------------------------------------------------
def _hint_loss_kernel(z0_ref, s_ref, t_ref, wslab_ref, bslab_ref, shift_ref,
                      weight_ref, loss_ref, *, conv_meta):
    """Per-program VMEM refs.

    z0_ref    : (H, W*2*dim) f32   cat([student, teacher], channel), lane-dense
    s_ref     : (H, W*dim)   f32   student hint slab (for the loss)
    t_ref     : (H, W*dim)   f32   teacher hint slab (for the loss)
    wslab_ref : (sum_k 3*W*Cin_k, max_k W*Cout_k) bf16  packed banded weights
    bslab_ref : (num_convs, max_k W*Cout_k) f32         packed lane-tiled biases
    shift_ref : (2, H, H) f32   [S_down, S_up] row-shift matrices (zero at edges)
    weight_ref: (H, W*dim) f32  sigmoid weight map (lane-dense output)
    loss_ref  : (1, W*dim) f32  per-program partial sum of weight*(s-t)^2
    conv_meta : static tuple of (row_offset, out_lanes) per fused conv
    """
    s_dn = shift_ref[0]                      # selects row h-1 (zero at h=0)
    s_up = shift_ref[1]                      # selects row h+1 (zero at h=H-1)

    z = z0_ref[...]                          # (H, W*Cin) f32, Cin = 2*dim
    num_convs = len(conv_meta)
    for idx, (row_off, out_lanes) in enumerate(conv_meta):
        in_lanes = z.shape[1]                # W*Cin (static)
        # Vertical +/-1 taps via tiny shift matmuls; concat along lanes builds
        # the full banded-im2col operand (H, 3*W*Cin) with zero relayout.
        a = jnp.concatenate(
            [jnp.dot(s_dn, z, preferred_element_type=jnp.float32),
             z,
             jnp.dot(s_up, z, preferred_element_type=jnp.float32)],
            axis=1).astype(jnp.bfloat16)
        wblk = wslab_ref[row_off:row_off + 3 * in_lanes, 0:out_lanes]     # bf16
        y = jnp.dot(a, wblk, preferred_element_type=jnp.float32)          # (H, W*Cout)
        y = y + bslab_ref[idx:idx + 1, 0:out_lanes]                       # f32 bias
        z = jnp.maximum(y, 0.0) if idx + 1 < num_convs else jax.nn.sigmoid(y)

    weight_ref[...] = z                      # lane-dense weight map
    d = s_ref[...] - t_ref[...]
    loss_ref[...] = jnp.sum(z * d * d, axis=0, keepdims=True)


# ----------------------------------------------------------------------------
# Wrapper-side weight plumbing (layout only; traced once under jit)
# ----------------------------------------------------------------------------
def _band_conv_weight(w_hwio, width):
    """(3,3,Cin,Cout) HWIO conv weight -> banded (3*W*Cin, W*Cout) matmul weight."""
    kh, kw, cin, cout = w_hwio.shape
    band = jnp.zeros((kh, width, cin, width, cout), jnp.float32)
    for wo in range(width):
        for kx in range(kw):
            wi = wo + kx - 1
            if 0 <= wi < width:
                band = band.at[:, wi, :, wo, :].set(w_hwio[:, kx].astype(jnp.float32))
    return band.reshape(kh * width * cin, width * cout)


def _block_diag_weight(ws, wt):
    """Fuse a student/teacher conv pair into one conv on the channel-concat."""
    kh, kw, ci_s, co_s = ws.shape
    _, _, ci_t, co_t = wt.shape
    out = jnp.zeros((kh, kw, ci_s + ci_t, co_s + co_t), jnp.float32)
    out = out.at[:, :, :ci_s, :co_s].set(ws.astype(jnp.float32))
    out = out.at[:, :, ci_s:, co_s:].set(wt.astype(jnp.float32))
    return out


def learnable_hint_loss(student_hint, teacher_hint, params):
    """student_hint / teacher_hint: NCHW. Returns (scalar loss, weight NCHW)."""
    s_nhwc = jnp.transpose(student_hint, (0, 2, 3, 1)).astype(jnp.float32)
    t_nhwc = jnp.transpose(teacher_hint, (0, 2, 3, 1)).astype(jnp.float32)
    n, h, w, dim = s_nhwc.shape

    # Lane-dense slabs (N, H, W*C); the last dim is the lane dim.
    s_slab = s_nhwc.reshape(n, h, w * dim)
    t_slab = t_nhwc.reshape(n, h, w * dim)
    z0_slab = jnp.concatenate([s_nhwc, t_nhwc], axis=-1).reshape(n, h, w * 2 * dim)

    # Fused conv list: block-diag(student_i, teacher_i) layers, then combine1/2.
    fused = []
    for (ws, bs), (wt, bt) in zip(params["conv_student"], params["conv_teacher"]):
        fused.append((_block_diag_weight(ws, wt),
                      jnp.concatenate([bs, bt]).astype(jnp.float32)))
    w1, b1 = params["conv_combine1"]
    w2, b2 = params["conv_combine2"]
    fused.append((w1.astype(jnp.float32), b1.astype(jnp.float32)))
    fused.append((w2.astype(jnp.float32), b2.astype(jnp.float32)))

    # Banded weights + packing into one bf16 weight slab and one f32 bias slab.
    bands, bias_rows, conv_meta, row_off = [], [], [], 0
    max_lanes = max(w * wgt.shape[-1] for wgt, _ in fused)
    for wgt, bias in fused:
        band = _band_conv_weight(wgt, w)                   # (3*W*Cin, W*Cout)
        out_lanes = band.shape[1]
        bands.append(jnp.pad(band, ((0, 0), (0, max_lanes - out_lanes))))
        bias_rows.append(jnp.pad(jnp.tile(bias, w), (0, max_lanes - out_lanes)))
        conv_meta.append((row_off, out_lanes))
        row_off += band.shape[0]
    wslab = jnp.concatenate(bands, axis=0).astype(jnp.bfloat16)
    bslab = jnp.stack(bias_rows).astype(jnp.float32)

    # Row-shift matrices: S_dn picks row h-1 (zero at h=0), S_up picks row h+1.
    shifts = jnp.stack([jnp.eye(h, h, k=-1, dtype=jnp.float32),
                        jnp.eye(h, h, k=1, dtype=jnp.float32)])

    kernel = functools.partial(_hint_loss_kernel, conv_meta=tuple(conv_meta))

    weight_slab, loss_parts = pl.pallas_call(
        kernel,
        grid=(n,),
        out_shape=(jax.ShapeDtypeStruct((n, h, w * dim), jnp.float32),
                   jax.ShapeDtypeStruct((n, 1, w * dim), jnp.float32)),
        in_specs=[
            pl.BlockSpec((None, h, w * 2 * dim), lambda b: (b, 0, 0)),   # z0
            pl.BlockSpec((None, h, w * dim), lambda b: (b, 0, 0)),       # student
            pl.BlockSpec((None, h, w * dim), lambda b: (b, 0, 0)),       # teacher
            pl.BlockSpec(wslab.shape, lambda b: (0, 0)),                 # weights
            pl.BlockSpec(bslab.shape, lambda b: (0, 0)),                 # biases
            pl.BlockSpec(shifts.shape, lambda b: (0, 0, 0)),             # shifts
        ],
        out_specs=(
            pl.BlockSpec((None, h, w * dim), lambda b: (b, 0, 0)),       # weight map
            pl.BlockSpec((None, 1, w * dim), lambda b: (b, 0, 0)),       # loss parts
        ),
        compiler_params=pltpu.CompilerParams(
            dimension_semantics=("parallel",)),
    )(z0_slab, s_slab, t_slab, wslab, bslab, shifts)

    loss = jnp.sum(loss_parts) / jnp.float32(n * h * w * dim)
    weight_nchw = jnp.transpose(weight_slab.reshape(n, h, w, dim), (0, 3, 1, 2))
    return loss, weight_nchw


# ----------------------------------------------------------------------------
# Deterministic synthetic parameters (mirrors the module structure)
# ----------------------------------------------------------------------------
def init_params(key, dim, hidden_dims):
    def conv_params(k, cin, cout):
        kw_, kb_ = jax.random.split(k)
        wgt = jax.random.normal(kw_, (3, 3, cin, cout), jnp.float32) * 0.05
        bias = jax.random.normal(kb_, (cout,), jnp.float32) * 0.05
        return wgt, bias

    keys = jax.random.split(key, 2 * len(hidden_dims) + 2)
    # Mirrors the module: every conv_student[i]/conv_teacher[i] has `dim`
    # input channels (the forward is only well-defined if hidden_dims[0]==dim).
    conv_student = [conv_params(keys[i], dim, hidden_dims[i])
                    for i in range(len(hidden_dims))]
    conv_teacher = [conv_params(keys[len(hidden_dims) + i], dim, hidden_dims[i])
                    for i in range(len(hidden_dims))]
    conv_combine1 = conv_params(keys[-2], hidden_dims[-1] * 2, dim)
    conv_combine2 = conv_params(keys[-1], dim, dim)
    return dict(conv_student=conv_student, conv_teacher=conv_teacher,
                conv_combine1=conv_combine1, conv_combine2=conv_combine2)


# ----------------------------------------------------------------------------
# Pure-JAX reference (correctness cross-check only)
# ----------------------------------------------------------------------------
def _reference_forward(student_hint, teacher_hint, params):
    def conv(x_nhwc, w_hwio, b):
        y = jax.lax.conv_general_dilated(
            x_nhwc, w_hwio, window_strides=(1, 1), padding="SAME",
            dimension_numbers=("NHWC", "HWIO", "NHWC"))
        return y + b.reshape(1, 1, 1, -1)

    s = jnp.transpose(student_hint, (0, 2, 3, 1)).astype(jnp.float32)
    t = jnp.transpose(teacher_hint, (0, 2, 3, 1)).astype(jnp.float32)
    sc, tc = s, t
    for (ws, bs), (wt, bt) in zip(params["conv_student"], params["conv_teacher"]):
        sc = jax.nn.relu(conv(sc, ws, bs))
        tc = jax.nn.relu(conv(tc, wt, bt))
    comb = jnp.concatenate([sc, tc], axis=-1)
    comb = jax.nn.relu(conv(comb, *params["conv_combine1"]))
    wgt = jax.nn.sigmoid(conv(comb, *params["conv_combine2"]))
    loss = jnp.mean(wgt * (s - t) ** 2)
    return loss, jnp.transpose(wgt, (0, 3, 1, 2))


if __name__ == "__main__":
    # Small shapes consistent with the module's forward
    # (dim must equal hidden_dims[0] for the reference forward to type-check).
    N, DIM, H, W = 2, 16, 8, 8
    HIDDEN_DIMS = (16, 8)

    key = jax.random.PRNGKey(0)
    kp, ks, kt = jax.random.split(key, 3)
    params = init_params(kp, DIM, HIDDEN_DIMS)

    student_hint = jax.random.normal(ks, (N, DIM, H, W), jnp.float32)
    teacher_hint = jax.random.normal(kt, (N, DIM, H, W), jnp.float32)

    loss, weight = jax.jit(learnable_hint_loss)(student_hint, teacher_hint, params)
    loss, weight = jax.block_until_ready((loss, weight))

    assert weight.shape == (N, DIM, H, W)
    assert loss.shape == ()

    # Cross-check against plain-XLA reference; tolerances loosened slightly
    # because matmul operands are bf16 (accumulation stays f32).
    ref_loss, ref_weight = _reference_forward(student_hint, teacher_hint, params)
    assert jnp.allclose(loss, ref_loss, rtol=2e-2, atol=1e-4)
    assert jnp.allclose(weight, ref_weight, rtol=2e-2, atol=1e-2)

    print("KERNEL_OK")
</pallas_src>

<mosaic_0001>
module attributes {stable_mosaic.version = 11 : i64} {
  func.func @_hint_loss_kernel(%arg0: i32, %arg1: memref<1x8x256xf32, #tpu.memory_space<vmem>>, %arg2: memref<1x8x128xf32, #tpu.memory_space<vmem>>, %arg3: memref<1x8x128xf32, #tpu.memory_space<vmem>>, %arg4: memref<2304x256xbf16, #tpu.memory_space<vmem>>, %arg5: memref<4x256xf32, #tpu.memory_space<vmem>>, %arg6: memref<2x8x8xf32, #tpu.memory_space<vmem>>, %arg7: memref<1x8x128xf32, #tpu.memory_space<vmem>>, %arg8: memref<1x1x128xf32, #tpu.memory_space<vmem>>) attributes {dimension_semantics = [#tpu.dimension_semantics<parallel>], iteration_bounds = array<i64: 2>, scalar_prefetch = 0 : i64, scratch_operands = 0 : i64, tpu.core_type = #tpu.core_type<tc>, window_params = [{transform_indices = @transform_0, window_bounds = array<i64: 1, 8, 256>}, {transform_indices = @transform_1, window_bounds = array<i64: 1, 8, 128>}, {transform_indices = @transform_2, window_bounds = array<i64: 1, 8, 128>}, {pipeline_mode = #tpu.pipeline_mode<synchronous>, transform_indices = @transform_3, window_bounds = array<i64: 2304, 256>}, {pipeline_mode = #tpu.pipeline_mode<synchronous>, transform_indices = @transform_4, window_bounds = array<i64: 4, 256>}, {pipeline_mode = #tpu.pipeline_mode<synchronous>, transform_indices = @transform_5, window_bounds = array<i64: 2, 8, 8>}, {transform_indices = @transform_6, window_bounds = array<i64: 1, 8, 128>}, {transform_indices = @transform_7, window_bounds = array<i64: 1, 1, 128>}]} {
    %c0 = arith.constant 0 : index
    %c0_0 = arith.constant 0 : index
    %c0_1 = arith.constant 0 : index
    %0 = vector.load %arg6[%c0, %c0_0, %c0_1] : memref<2x8x8xf32, #tpu.memory_space<vmem>>, vector<1x8x8xf32>
    %1 = vector.shape_cast %0 : vector<1x8x8xf32> to vector<8x8xf32>
    %c1 = arith.constant 1 : index
    %c0_2 = arith.constant 0 : index
    %c0_3 = arith.constant 0 : index
    %2 = vector.load %arg6[%c1, %c0_2, %c0_3] : memref<2x8x8xf32, #tpu.memory_space<vmem>>, vector<1x8x8xf32>
    %3 = vector.shape_cast %2 : vector<1x8x8xf32> to vector<8x8xf32>
    %c0_4 = arith.constant 0 : index
    %c0_5 = arith.constant 0 : index
    %c0_6 = arith.constant 0 : index
    %4 = vector.load %arg1[%c0_4, %c0_5, %c0_6] : memref<1x8x256xf32, #tpu.memory_space<vmem>>, vector<1x8x256xf32>
    %5 = vector.shape_cast %4 : vector<1x8x256xf32> to vector<8x256xf32>
    %cst = arith.constant dense<0.000000e+00> : vector<8x256xf32>
    %6 = tpu.matmul %1, %5, %cst {dimension_numbers = #tpu.dot_dimension_numbers<[1], [0], [0], [1], [0, 0, 1, 1], [], []>} : vector<8x8xf32>, vector<8x256xf32>, vector<8x256xf32> -> vector<8x256xf32>
    %cst_7 = arith.constant dense<0.000000e+00> : vector<8x256xf32>
    %7 = tpu.matmul %3, %5, %cst_7 {dimension_numbers = #tpu.dot_dimension_numbers<[1], [0], [0], [1], [0, 0, 1, 1], [], []>} : vector<8x8xf32>, vector<8x256xf32>, vector<8x256xf32> -> vector<8x256xf32>
    %8 = tpu.concatenate %6, %5, %7 in 1 : vector<8x256xf32>, vector<8x256xf32>, vector<8x256xf32> -> vector<8x768xf32>
    %9 = arith.truncf %8 : vector<8x768xf32> to vector<8x768xbf16>
    %c0_8 = arith.constant 0 : index
    %c0_9 = arith.constant 0 : index
    %10 = vector.load %arg4[%c0_8, %c0_9] : memref<2304x256xbf16, #tpu.memory_space<vmem>>, vector<768x256xbf16>
    %cst_10 = arith.constant dense<0.000000e+00> : vector<8x256xf32>
    %11 = tpu.matmul %9, %10, %cst_10 {dimension_numbers = #tpu.dot_dimension_numbers<[1], [0], [0], [1], [0, 0, 1, 1], [], []>} : vector<8x768xbf16>, vector<768x256xbf16>, vector<8x256xf32> -> vector<8x256xf32>
    %c0_11 = arith.constant 0 : index
    %c0_12 = arith.constant 0 : index
    %12 = vector.load %arg5[%c0_11, %c0_12] : memref<4x256xf32, #tpu.memory_space<vmem>>, vector<1x256xf32>
    %13 = vector.broadcast %12 : vector<1x256xf32> to vector<8x256xf32>
    %14 = arith.addf %11, %13 : vector<8x256xf32>
    %cst_13 = arith.constant 0.000000e+00 : f32
    %15 = vector.broadcast %cst_13 : f32 to vector<8x256xf32>
    %16 = arith.maximumf %14, %15 : vector<8x256xf32>
    %cst_14 = arith.constant dense<0.000000e+00> : vector<8x256xf32>
    %17 = tpu.matmul %1, %16, %cst_14 {dimension_numbers = #tpu.dot_dimension_numbers<[1], [0], [0], [1], [0, 0, 1, 1], [], []>} : vector<8x8xf32>, vector<8x256xf32>, vector<8x256xf32> -> vector<8x256xf32>
    %cst_15 = arith.constant dense<0.000000e+00> : vector<8x256xf32>
    %18 = tpu.matmul %3, %16, %cst_15 {dimension_numbers = #tpu.dot_dimension_numbers<[1], [0], [0], [1], [0, 0, 1, 1], [], []>} : vector<8x8xf32>, vector<8x256xf32>, vector<8x256xf32> -> vector<8x256xf32>
    %19 = tpu.concatenate %17, %16, %18 in 1 : vector<8x256xf32>, vector<8x256xf32>, vector<8x256xf32> -> vector<8x768xf32>
    %20 = arith.truncf %19 : vector<8x768xf32> to vector<8x768xbf16>
    %c768 = arith.constant 768 : index
    %c0_16 = arith.constant 0 : index
    %21 = vector.load %arg4[%c768, %c0_16] : memref<2304x256xbf16, #tpu.memory_space<vmem>>, vector<768x128xbf16>
    %cst_17 = arith.constant dense<0.000000e+00> : vector<8x128xf32>
    %22 = tpu.matmul %20, %21, %cst_17 {dimension_numbers = #tpu.dot_dimension_numbers<[1], [0], [0], [1], [0, 0, 1, 1], [], []>} : vector<8x768xbf16>, vector<768x128xbf16>, vector<8x128xf32> -> vector<8x128xf32>
    %c1_18 = arith.constant 1 : index
    %c0_19 = arith.constant 0 : index
    %23 = vector.load %arg5[%c1_18, %c0_19] : memref<4x256xf32, #tpu.memory_space<vmem>>, vector<1x128xf32>
    %24 = vector.broadcast %23 : vector<1x128xf32> to vector<8x128xf32>
    %25 = arith.addf %22, %24 : vector<8x128xf32>
    %cst_20 = arith.constant 0.000000e+00 : f32
    %26 = vector.broadcast %cst_20 : f32 to vector<8x128xf32>
    %27 = arith.maximumf %25, %26 : vector<8x128xf32>
    %cst_21 = arith.constant dense<0.000000e+00> : vector<8x128xf32>
    %28 = tpu.matmul %1, %27, %cst_21 {dimension_numbers = #tpu.dot_dimension_numbers<[1], [0], [0], [1], [0, 0, 1, 1], [], []>} : vector<8x8xf32>, vector<8x128xf32>, vector<8x128xf32> -> vector<8x128xf32>
    %cst_22 = arith.constant dense<0.000000e+00> : vector<8x128xf32>
    %29 = tpu.matmul %3, %27, %cst_22 {dimension_numbers = #tpu.dot_dimension_numbers<[1], [0], [0], [1], [0, 0, 1, 1], [], []>} : vector<8x8xf32>, vector<8x128xf32>, vector<8x128xf32> -> vector<8x128xf32>
    %30 = tpu.concatenate %28, %27, %29 in 1 : vector<8x128xf32>, vector<8x128xf32>, vector<8x128xf32> -> vector<8x384xf32>
    %31 = arith.truncf %30 : vector<8x384xf32> to vector<8x384xbf16>
    %c1536 = arith.constant 1536 : index
    %c0_23 = arith.constant 0 : index
    %32 = vector.load %arg4[%c1536, %c0_23] : memref<2304x256xbf16, #tpu.memory_space<vmem>>, vector<384x128xbf16>
    %cst_24 = arith.constant dense<0.000000e+00> : vector<8x128xf32>
    %33 = tpu.matmul %31, %32, %cst_24 {dimension_numbers = #tpu.dot_dimension_numbers<[1], [0], [0], [1], [0, 0, 1, 1], [], []>} : vector<8x384xbf16>, vector<384x128xbf16>, vector<8x128xf32> -> vector<8x128xf32>
    %c2 = arith.constant 2 : index
    %c0_25 = arith.constant 0 : index
    %34 = vector.load %arg5[%c2, %c0_25] : memref<4x256xf32, #tpu.memory_space<vmem>>, vector<1x128xf32>
    %35 = vector.broadcast %34 : vector<1x128xf32> to vector<8x128xf32>
    %36 = arith.addf %33, %35 : vector<8x128xf32>
    %cst_26 = arith.constant 0.000000e+00 : f32
    %37 = vector.broadcast %cst_26 : f32 to vector<8x128xf32>
    %38 = arith.maximumf %36, %37 : vector<8x128xf32>
    %cst_27 = arith.constant dense<0.000000e+00> : vector<8x128xf32>
    %39 = tpu.matmul %1, %38, %cst_27 {dimension_numbers = #tpu.dot_dimension_numbers<[1], [0], [0], [1], [0, 0, 1, 1], [], []>} : vector<8x8xf32>, vector<8x128xf32>, vector<8x128xf32> -> vector<8x128xf32>
    %cst_28 = arith.constant dense<0.000000e+00> : vector<8x128xf32>
    %40 = tpu.matmul %3, %38, %cst_28 {dimension_numbers = #tpu.dot_dimension_numbers<[1], [0], [0], [1], [0, 0, 1, 1], [], []>} : vector<8x8xf32>, vector<8x128xf32>, vector<8x128xf32> -> vector<8x128xf32>
    %41 = tpu.concatenate %39, %38, %40 in 1 : vector<8x128xf32>, vector<8x128xf32>, vector<8x128xf32> -> vector<8x384xf32>
    %42 = arith.truncf %41 : vector<8x384xf32> to vector<8x384xbf16>
    %c1920 = arith.constant 1920 : index
    %c0_29 = arith.constant 0 : index
    %43 = vector.load %arg4[%c1920, %c0_29] : memref<2304x256xbf16, #tpu.memory_space<vmem>>, vector<384x128xbf16>
    %cst_30 = arith.constant dense<0.000000e+00> : vector<8x128xf32>
    %44 = tpu.matmul %42, %43, %cst_30 {dimension_numbers = #tpu.dot_dimension_numbers<[1], [0], [0], [1], [0, 0, 1, 1], [], []>} : vector<8x384xbf16>, vector<384x128xbf16>, vector<8x128xf32> -> vector<8x128xf32>
    %c3 = arith.constant 3 : index
    %c0_31 = arith.constant 0 : index
    %45 = vector.load %arg5[%c3, %c0_31] : memref<4x256xf32, #tpu.memory_space<vmem>>, vector<1x128xf32>
    %46 = vector.broadcast %45 : vector<1x128xf32> to vector<8x128xf32>
    %47 = arith.addf %44, %46 : vector<8x128xf32>
    %48 = arith.negf %47 : vector<8x128xf32>
    %49 = math.exp %48 : vector<8x128xf32>
    %cst_32 = arith.constant 1.000000e+00 : f32
    %50 = vector.broadcast %cst_32 : f32 to vector<8x128xf32>
    %51 = arith.addf %50, %49 : vector<8x128xf32>
    %52 = arith.divf %50, %51 : vector<8x128xf32>
    %c0_33 = arith.constant 0 : index
    %c0_34 = arith.constant 0 : index
    %c0_35 = arith.constant 0 : index
    %53 = vector.load %arg7[%c0_33, %c0_34, %c0_35] : memref<1x8x128xf32, #tpu.memory_space<vmem>>, vector<1x8x128xf32>
    %54 = vector.shape_cast %53 : vector<1x8x128xf32> to vector<8x128xf32>
    %55 = vector.shape_cast %52 : vector<8x128xf32> to vector<1x8x128xf32>
    tpu.vector_store %arg7[%c0_33, %c0_34, %c0_35], %55 {strides = array<i32>} : memref<1x8x128xf32, #tpu.memory_space<vmem>>, vector<1x8x128xf32>,
    %c0_36 = arith.constant 0 : index
    %c0_37 = arith.constant 0 : index
    %c0_38 = arith.constant 0 : index
    %56 = vector.load %arg2[%c0_36, %c0_37, %c0_38] : memref<1x8x128xf32, #tpu.memory_space<vmem>>, vector<1x8x128xf32>
    %57 = vector.shape_cast %56 : vector<1x8x128xf32> to vector<8x128xf32>
    %c0_39 = arith.constant 0 : index
    %c0_40 = arith.constant 0 : index
    %c0_41 = arith.constant 0 : index
    %58 = vector.load %arg3[%c0_39, %c0_40, %c0_41] : memref<1x8x128xf32, #tpu.memory_space<vmem>>, vector<1x8x128xf32>
    %59 = vector.shape_cast %58 : vector<1x8x128xf32> to vector<8x128xf32>
    %60 = arith.subf %57, %59 : vector<8x128xf32>
    %61 = arith.mulf %52, %60 : vector<8x128xf32>
    %62 = arith.mulf %61, %60 : vector<8x128xf32>
    %cst_42 = arith.constant dense<0.000000e+00> : vector<128xf32>
    %63 = vector.multi_reduction <add>, %62, %cst_42 [0] : vector<8x128xf32> to vector<128xf32>
    %64 = vector.shape_cast %63 : vector<128xf32> to vector<1x128xf32>
    %c0_43 = arith.constant 0 : index
    %c0_44 = arith.constant 0 : index
    %c0_45 = arith.constant 0 : index
    %65 = vector.load %arg8[%c0_43, %c0_44, %c0_45] : memref<1x1x128xf32, #tpu.memory_space<vmem>>, vector<1x1x128xf32>
    %66 = vector.shape_cast %65 : vector<1x1x128xf32> to vector<1x128xf32>
    %67 = vector.shape_cast %64 : vector<1x128xf32> to vector<1x1x128xf32>
    tpu.vector_store %arg8[%c0_43, %c0_44, %c0_45], %67 {strides = array<i32>} : memref<1x1x128xf32, #tpu.memory_space<vmem>>, vector<1x1x128xf32>,
    return
  }
  func.func @transform_0(%arg0: i32) -> (i32, i32, i32) {
    %c0_i32 = arith.constant 0 : i32
    %c0_i32_0 = arith.constant 0 : i32
    %c0_i32_1 = arith.constant 0 : i32
    return %arg0, %c0_i32, %c0_i32_0 : i32, i32, i32
  }
  func.func @transform_1(%arg0: i32) -> (i32, i32, i32) {
    %c0_i32 = arith.constant 0 : i32
    %c0_i32_0 = arith.constant 0 : i32
    %c0_i32_1 = arith.constant 0 : i32
    return %arg0, %c0_i32, %c0_i32_0 : i32, i32, i32
  }
  func.func @transform_2(%arg0: i32) -> (i32, i32, i32) {
    %c0_i32 = arith.constant 0 : i32
    %c0_i32_0 = arith.constant 0 : i32
    %c0_i32_1 = arith.constant 0 : i32
    return %arg0, %c0_i32, %c0_i32_0 : i32, i32, i32
  }
  func.func @transform_3(%arg0: i32) -> (i32, i32) {
    %c0_i32 = arith.constant 0 : i32
    %c0_i32_0 = arith.constant 0 : i32
    %c0_i32_1 = arith.constant 0 : i32
    return %c0_i32, %c0_i32_0 : i32, i32
  }
  func.func @transform_4(%arg0: i32) -> (i32, i32) {
    %c0_i32 = arith.constant 0 : i32
    %c0_i32_0 = arith.constant 0 : i32
    %c0_i32_1 = arith.constant 0 : i32
    return %c0_i32, %c0_i32_0 : i32, i32
  }
  func.func @transform_5(%arg0: i32) -> (i32, i32, i32) {
    %c0_i32 = arith.constant 0 : i32
    %c0_i32_0 = arith.constant 0 : i32
    %c0_i32_1 = arith.constant 0 : i32
    %c0_i32_2 = arith.constant 0 : i32
    return %c0_i32, %c0_i32_0, %c0_i32_1 : i32, i32, i32
  }
  func.func @transform_6(%arg0: i32) -> (i32, i32, i32) {
    %c0_i32 = arith.constant 0 : i32
    %c0_i32_0 = arith.constant 0 : i32
    %c0_i32_1 = arith.constant 0 : i32
    return %arg0, %c0_i32, %c0_i32_0 : i32, i32, i32
  }
  func.func @transform_7(%arg0: i32) -> (i32, i32, i32) {
    %c0_i32 = arith.constant 0 : i32
    %c0_i32_0 = arith.constant 0 : i32
    %c0_i32_1 = arith.constant 0 : i32
    return %arg0, %c0_i32, %c0_i32_0 : i32, i32, i32
  }
}

</mosaic_0001>

<bundles_post_ra>
// kernel: tile.38
= control target key start
LH: loop header
LB: loop body
LE: loop exit
PB: predicated region body
PF: predicated region fallthrough
CT: control target
= control target key end

     0   :  { %s22_s0 = inlined_call_operand.vmem [shape: f32[16], index: 0, kind: input, shape index: {}]   ;;  %s23_s1 = inlined_call_operand.vmem [shape: f32[8,16], index: 1, kind: output, shape index: {}]  }
   0x1   :  { %v4_v0 = vld [vmem:[%s22_s0] ss:$0 sm:$0xff] }
   0x2   :  { %5 = vst [vmem:[%s23_s1] sm:$0xff] %v4_v0 }

// kernel: tile.39
= control target key start
LH: loop header
LB: loop body
LE: loop exit
PB: predicated region body
PF: predicated region fallthrough
CT: control target
= control target key end

     0   :  { %s67_s10 = smov 112   ;;  %s68_s11 = smov 80   ;;  %vm3_vm0 = vcmask 130048   ;;  %vm9_vm1 = vcmask 1048448   ;;  %vm15_vm2 = vcmask 917248   ;;  %vm21_vm3 = vcmask 786048   ;;  %s111_s0 = inlined_call_operand.vmem [shape: f32[8,16], index: 0, kind: input, shape index: {}]   ;;  %s112_s1 = inlined_call_operand.vmem [shape: f32[128], index: 1, kind: output, shape index: {}]  }
   0x1   :  { %v53_v0 = vld [vmem:[%s111_s0 + $0x7] sm:$0x1]   ;;  %v55_v1 = vld [vmem:[%s111_s0 + $0x5] sm:$0x1]   ;;  %v54_v2 = vld [vmem:[%s111_s0 + $0x6] sm:$0x1]  }
   0x2   :  { %7 = vrot.lane.b32.xlu0 %v53_v0, %s67_s10  ;;  %19 = vrot.lane.b32.xlu1 %v55_v1, %s68_s11  ;;  %v56_v3 = vld [vmem:[%s111_s0 + $0x4] sm:$0x1]   ;;  %v2_v4 = vld [vmem:[%s111_s0] sm:$0x1]   ;;  %s69_s18 = smov 96   ;;  %s70_s19 = smov 64  }
   0x3   :  { %4 = vst.msk [vmem:[#allocation0] sm:$0x1] %vm3_vm0, %v2_v4   ;;  %v57_v5 = vld [vmem:[%s111_s0 + $0x3] sm:$0x1]   ;;  %v58_v6 = vld [vmem:[%s111_s0 + $0x2] sm:$0x1]  }
   0x4   :  { %s71_s24 = smov 48   ;;  %s72_s25 = smov 32   ;;  %v59_v7 = vld [vmem:[%s111_s0 + $0x1] sm:$0x1]   ;;  %vm27_vm4 = vcmask 654848   ;;  %vm33_vm5 = vcmask 523648  }
   0x5   :  { %s73_s0 = smov 16   ;;  %vm39_vm6 = vcmask 392448   ;;  %vm45_vm7 = vcmask 261248  }
   0x6   :  { %13 = vrot.lane.b32.xlu0 %v54_v2, %s69_s18  ;;  %25 = vrot.lane.b32.xlu1 %v56_v3, %s70_s19 }
   0xa   :  { %31 = vrot.lane.b32.xlu0 %v57_v5, %s71_s24  ;;  %37 = vrot.lane.b32.xlu1 %v58_v6, %s72_s25 }
   0xe   :  { %43 = vrot.lane.b32.xlu0 %v59_v7, %s73_s0 }
  0x74   :  { %v8_v8 = vpop.permute.xlu0 %7   ;;  %v20_v9 = vpop.permute.xlu1 %19  }
  0x75   :  { %10 = vst.msk [vmem:[#allocation0] sm:$0x1] %vm9_vm1, %v8_v8  }
  0x78   :  { %v14_v10 = vpop.permute.xlu0 %13   ;;  %v26_v11 = vpop.permute.xlu1 %25  }
  0x79   :  { %16 = vst.msk [vmem:[#allocation0] sm:$0x1] %vm15_vm2, %v14_v10  }
  0x7a   :  { %22 = vst.msk [vmem:[#allocation0] sm:$0x1] %vm21_vm3, %v20_v9  }
  0x7b   :  { %28 = vst.msk [vmem:[#allocation0] sm:$0x1] %vm27_vm4, %v26_v11  }
  0x7c   :  { %v32_v12 = vpop.permute.xlu0 %31   ;;  %v38_v13 = vpop.permute.xlu1 %37  }
  0x7d   :  { %34 = vst.msk [vmem:[#allocation0] sm:$0x1] %vm33_vm5, %v32_v12  }
  0x7e   :  { %40 = vst.msk [vmem:[#allocation0] sm:$0x1] %vm39_vm6, %v38_v13  }
  0x80   :  { %v44_v14 = vpop.permute.xlu0 %43  }
  0x81   :  { %46 = vst.msk [vmem:[#allocation0] sm:$0x1] %vm45_vm7, %v44_v14  }
  0x88   :  { %v50_v15 = vld [vmem:[#allocation0] sm:$0x1] }
  0x89   :  { %52 = vst [vmem:[%s112_s1] sm:$0x1] %v50_v15 }

// kernel: tile.23
= control target key start
LH: loop header
LB: loop body
LE: loop exit
PB: predicated region body
PF: predicated region fallthrough
CT: control target
= control target key end

     0   :  { %s22_s0 = inlined_call_operand.vmem [shape: f32[32], index: 0, kind: input, shape index: {}]   ;;  %s23_s1 = inlined_call_operand.vmem [shape: f32[8,32], index: 1, kind: output, shape index: {}]  }
   0x1   :  { %v4_v0 = vld [vmem:[%s22_s0] ss:$0 sm:$0xff] }
   0x2   :  { %5 = vst [vmem:[%s23_s1] sm:$0xff] %v4_v0 }

// kernel: learnable_hint_loss.1
= control target key start
LH: loop header
LB: loop body
LE: loop exit
PB: predicated region body
PF: predicated region fallthrough
CT: control target
= control target key end

     0   :  { %s3544_s24 = smov 0   ;;  %s4259_s0 = inlined_call_operand.vmem [shape: f32[2,8,256], index: 0, kind: input, shape index: {}]   ;;  %s4260_s1 = inlined_call_operand.vmem [shape: f32[2,8,128], index: 1, kind: input, shape index: {}]   ;;  %s4261_s2 = inlined_call_operand.vmem [shape: f32[2,8,128], index: 2, kind: input, shape index: {}]   ;;  %s4262_s3 = inlined_call_operand.vmem [shape: bf16[2304,256], index: 3, kind: input, shape index: {}]   ;;  %s4263_s4 = inlined_call_operand.vmem [shape: f32[4,256], index: 4, kind: input, shape index: {}]   ;;  %s4264_s5 = inlined_call_operand.vmem [shape: f32[2,8,8], index: 5, kind: input, shape index: {}]   ;;  %s4265_s6 = inlined_call_operand.vmem [shape: f32[2,8,128], index: 6, kind: output, shape index: {0}]   ;;  %s4266_s7 = inlined_call_operand.vmem [shape: f32[2,1,128], index: 7, kind: output, shape index: {1}]  }
   0x1 LB: > { %s2814_s25 = sadd.s32 4294967295, %s3500_s24   ;;  %p2818_p0 = scmp.ge.s32.totalorder %s3500_s24, 1  ;;  %s3500_s24 = sphi %s3544_s24, %s18_s24  }
   0x2   : > { %p258_p1 = scmp.lt.s32.totalorder %s3500_s24, 3 }
   0x4   : > { %p259_p2 = pnand %p2818_p0, %p258_p1 }
   0x5   : > { %p300_p3 = scmp.lt.s32.totalorder (!%p259_p2), %s2814_s25, 1  ;;  %v3502_v0 = vmov (!%p259_p2), 0.0   ;;  %v321_v1 = vld [vmem:[%s4264_s5] sm:$0xff] (!%p259_p2)  ;;  %v2824_v2 = vld [vmem:[%s4264_s5 + $0x8] sm:$0xff] (!%p259_p2)  ;;  %vm326_vm0 = vcmask (!%p259_p2), 64512   ;;  %vm3503_vm1 = vmmov (!%p259_p2), 0  }
   0x6   : > { %262 = sbr.rel (%p259_p2) target bundleno = 2021 (0x7e5), region = 44  ;;  %394 = vmatprep.mubr.f32.mxu0 (!%p259_p2), %v3502_v0  ;;  %468 = vmatprep.mubr.f32.mxu1 (!%p259_p2), %v3502_v0  ;;  %v3250_v5 = vld [vmem:[%s4262_s3 + $0x4] ss:$8 sps:$4 sm:$0xff] (!%p259_p2)   ;;  %v3248_v6 = vld [vmem:[%s4262_s3] ss:$8 sps:$4 sm:$0xff] (!%p259_p2)  }
   0x7   : > { %v3253_v7 = vld [vmem:[%s4262_s3 + $0x14] ss:$8 sps:$4 sm:$0xff] (!%p259_p2)   ;;  %v3251_v8 = vld [vmem:[%s4262_s3 + $0x10] ss:$8 sps:$4 sm:$0xff] (!%p259_p2)   ;;  %v3256_v9 = vld [vmem:[%s4262_s3 + $0x24] ss:$8 sps:$4 sm:$0xff] (!%p259_p2)  }
   0x8   : > { %v3254_v10 = vld [vmem:[%s4262_s3 + $0x20] ss:$8 sps:$4 sm:$0xff] (!%p259_p2)   ;;  %v3259_v11 = vld [vmem:[%s4262_s3 + $0x34] ss:$8 sps:$4 sm:$0xff] (!%p259_p2)   ;;  %v3257_v12 = vld [vmem:[%s4262_s3 + $0x30] ss:$8 sps:$4 sm:$0xff] (!%p259_p2)  }
   0x9   : > { %v3262_v13 = vld [vmem:[%s4262_s3 + $0x44] ss:$8 sps:$4 sm:$0xff] (!%p259_p2)   ;;  %v3260_v14 = vld [vmem:[%s4262_s3 + $0x40] ss:$8 sps:$4 sm:$0xff] (!%p259_p2)   ;;  %v3265_v15 = vld [vmem:[%s4262_s3 + $0x54] ss:$8 sps:$4 sm:$0xff] (!%p259_p2)  }
   0xa   : > { %v3263_v16 = vld [vmem:[%s4262_s3 + $0x50] ss:$8 sps:$4 sm:$0xff] (!%p259_p2)   ;;  %v3268_v17 = vld [vmem:[%s4262_s3 + $0x64] ss:$8 sps:$4 sm:$0xff] (!%p259_p2)   ;;  %v3266_v18 = vld [vmem:[%s4262_s3 + $0x60] ss:$8 sps:$4 sm:$0xff] (!%p259_p2)  }
   0xb   : > { %v3271_v19 = vld [vmem:[%s4262_s3 + $0x74] ss:$8 sps:$4 sm:$0xff] (!%p259_p2)   ;;  %v3269_v20 = vld [vmem:[%s4262_s3 + $0x70] ss:$8 sps:$4 sm:$0xff] (!%p259_p2)   ;;  %v3274_v21 = vld [vmem:[%s4262_s3 + $0x84] ss:$8 sps:$4 sm:$0xff] (!%p259_p2)  }
   0xc   : > { %v3272_v22 = vld [vmem:[%s4262_s3 + $0x80] ss:$8 sps:$4 sm:$0xff] (!%p259_p2)   ;;  %v3277_v23 = vld [vmem:[%s4262_s3 + $0x94] ss:$8 sps:$4 sm:$0xff] (!%p259_p2)   ;;  %v3275_v24 = vld [vmem:[%s4262_s3 + $0x90] ss:$8 sps:$4 sm:$0xff] (!%p259_p2)  }
   0xd   : > { %s4268_s25 = smov (!%p300_p3, %s2814_s25), 1  ;;  %v3280_v25 = vld [vmem:[%s4262_s3 + $0xa4] ss:$8 sps:$4 sm:$0xff]   ;;  %v3278_v26 = vld [vmem:[%s4262_s3 + $0xa0] ss:$8 sps:$4 sm:$0xff]  }
   0xe   : > { %s3031_s26 = sshll.u32 %s4268_s25, 4  ;;  %v3283_v27 = vld [vmem:[%s4262_s3 + $0xb4] ss:$8 sps:$4 sm:$0xff]   ;;  %v3281_v28 = vld [vmem:[%s4262_s3 + $0xb0] ss:$8 sps:$4 sm:$0xff]   ;;  %s319_s20 = scalar_lea.vmem %s4266_s7, %s4268_s25 }
   0xf   : > { %s304_s8 = scalar_lea.vmem %s4259_s0, %s3031_s26  ;;  %v3286_v29 = vld [vmem:[%s4262_s3 + $0xc4] ss:$8 sps:$4 sm:$0xff]   ;;  %v3284_v30 = vld [vmem:[%s4262_s3 + $0xc0] ss:$8 sps:$4 sm:$0xff]   ;;  %v3289_v31 = vld [vmem:[%s4262_s3 + $0xd4] ss:$8 sps:$4 sm:$0xff]  }
  0x10   : > { %v3566_v3 = vld [vmem:[%s304_s8 + $0x8] sm:$0xff]  ;;  %v3568_v4 = vld [vmem:[%s304_s8] sm:$0xff]  ;;  %v3287_v32 = vld [vmem:[%s4262_s3 + $0xd0] ss:$8 sps:$4 sm:$0xff]   ;;  %s2821_s8 = sshll.u32 %s4268_s25, 3 }
  0x11   : > { %330 = vmatprep.subr.mxu0 %v3566_v3  ;;  %404 = vmatprep.subr.mxu1 %v3566_v3  ;;  %v3292_v33 = vld [vmem:[%s4262_s3 + $0xe4] ss:$8 sps:$4 sm:$0xff]   ;;  %v3290_v34 = vld [vmem:[%s4262_s3 + $0xe0] ss:$8 sps:$4 sm:$0xff]   ;;  %v3295_v35 = vld [vmem:[%s4262_s3 + $0xf4] ss:$8 sps:$4 sm:$0xff]   ;;  %v478_v44 = vpack.c.bf16 %v3566_v3, %v3566_v3  ;;  %s308_s11 = scalar_lea.vmem %s4260_s1, %s2821_s8  ;;  %s312_s14 = scalar_lea.vmem %s4261_s2, %s2821_s8 }
  0x12   : > { %331 = vmatpush1.msra.mxu0 %v3568_v4  ;;  %405 = vmatpush1.msra.mxu1 %v3568_v4  ;;  %v3293_v36 = vld [vmem:[%s4262_s3 + $0xf0] ss:$8 sps:$4 sm:$0xff]   ;;  %v3298_v37 = vld [vmem:[%s4262_s3 + $0x104] ss:$8 sps:$4 sm:$0xff]   ;;  %v3296_v43 = vld [vmem:[%s4262_s3 + $0x100] ss:$8 sps:$4 sm:$0xff]   ;;  %s316_s17 = scalar_lea.vmem %s4265_s6, %s2821_s8 }
  0x13   : > { %2825 = vmatmul.mubr.msk.f32.vlgmr.msra.gmra.mrb[0].mxu0 %vm326_vm0, %v321_v1  ;;  %2826 = vmatmul.mubr.msk.f32.vlgmr.msra.gmra.mrb[0].mxu1 %vm326_vm0, %v2824_v2  ;;  %v3301_v46 = vld [vmem:[%s4262_s3 + $0x114] ss:$8 sps:$4 sm:$0xff]   ;;  %v3299_v47 = vld [vmem:[%s4262_s3 + $0x110] ss:$8 sps:$4 sm:$0xff]   ;;  %v3304_v48 = vld [vmem:[%s4262_s3 + $0x124] ss:$8 sps:$4 sm:$0xff]  }
  0x14   : > { %1069 = vmatprep.subr.bf16.mxu0 %v3250_v5  ;;  %1258 = vmatprep.mubr.f32.mxu1 %v3502_v0  ;;  %v3302_v49 = vld [vmem:[%s4262_s3 + $0x120] ss:$8 sps:$4 sm:$0xff]   ;;  %v3307_v50 = vld [vmem:[%s4262_s3 + $0x134] ss:$8 sps:$4 sm:$0xff]   ;;  %v3305_v51 = vld [vmem:[%s4262_s3 + $0x130] ss:$8 sps:$4 sm:$0xff]  }
  0x15   : > { %1070 = vmatpush1.bf16.msra.mxu0 %v3248_v6  ;;  %v3310_v52 = vld [vmem:[%s4262_s3 + $0x144] ss:$8 sps:$4 sm:$0xff]   ;;  %v3308_v53 = vld [vmem:[%s4262_s3 + $0x140] ss:$8 sps:$4 sm:$0xff]   ;;  %v3313_v54 = vld [vmem:[%s4262_s3 + $0x154] ss:$8 sps:$4 sm:$0xff]  }
  0x16   : > { %1071 = vmatprep.subr.bf16.mxu0 %v3253_v7  ;;  %v3311_v55 = vld [vmem:[%s4262_s3 + $0x150] ss:$8 sps:$4 sm:$0xff]   ;;  %v3316_v56 = vld [vmem:[%s4262_s3 + $0x164] ss:$8 sps:$4 sm:$0xff]   ;;  %v3314_v57 = vld [vmem:[%s4262_s3 + $0x160] ss:$8 sps:$4 sm:$0xff]  }
  0x17   : > { %v3319_v58 = vld [vmem:[%s4262_s3 + $0x174] ss:$8 sps:$4 sm:$0xff]   ;;  %v3317_v59 = vld [vmem:[%s4262_s3 + $0x170] ss:$8 sps:$4 sm:$0xff]   ;;  %v3322_v60 = vld [vmem:[%s4262_s3 + $0x184] ss:$8 sps:$4 sm:$0xff]  }
  0x18   : > { %v3320_v61 = vld [vmem:[%s4262_s3 + $0x180] ss:$8 sps:$4 sm:$0xff]   ;;  %v3325_v62 = vld [vmem:[%s4262_s3 + $0x194] ss:$8 sps:$4 sm:$0xff]   ;;  %v3323_v63 = vld [vmem:[%s4262_s3 + $0x190] ss:$8 sps:$4 sm:$0xff]  }
  0x19   : > { %1072 = vmatpush1.bf16.msra.mxu0 %v3251_v8  ;;  %v3328_v1 = vld [vmem:[%s4262_s3 + $0x1a4] ss:$8 sps:$4 sm:$0xff]   ;;  %v3326_v2 = vld [vmem:[%s4262_s3 + $0x1a0] ss:$8 sps:$4 sm:$0xff]   ;;  %v3331_v3 = vld [vmem:[%s4262_s3 + $0x1b4] ss:$8 sps:$4 sm:$0xff]  }
  0x1a   : > { %1073 = vmatprep.subr.bf16.mxu0 %v3256_v9  ;;  %v3329_v5 = vld [vmem:[%s4262_s3 + $0x1b0] ss:$8 sps:$4 sm:$0xff]   ;;  %v3334_v6 = vld [vmem:[%s4262_s3 + $0x1c4] ss:$8 sps:$4 sm:$0xff]   ;;  %v3332_v7 = vld [vmem:[%s4262_s3 + $0x1c0] ss:$8 sps:$4 sm:$0xff]  }
  0x1b   : > { %v3337_v8 = vld [vmem:[%s4262_s3 + $0x1d4] ss:$8 sps:$4 sm:$0xff]   ;;  %v3335_v9 = vld [vmem:[%s4262_s3 + $0x1d0] ss:$8 sps:$4 sm:$0xff]  }
  0x1d   : > { %1074 = vmatpush1.bf16.msra.mxu0 %v3254_v10  ;;  %v3340_v10 = vld [vmem:[%s4262_s3 + $0x1e4] ss:$8 sps:$4 sm:$0xff]  }
  0x1e   : > { %1075 = vmatprep.subr.bf16.mxu0 %v3259_v11  ;;  %v3338_v11 = vld [vmem:[%s4262_s3 + $0x1e0] ss:$8 sps:$4 sm:$0xff]  }
  0x21   : > { %1076 = vmatpush1.bf16.msra.mxu0 %v3257_v12  ;;  %v3343_v12 = vld [vmem:[%s4262_s3 + $0x1f4] ss:$8 sps:$4 sm:$0xff]  }
  0x22   : > { %1077 = vmatprep.subr.bf16.mxu0 %v3262_v13  ;;  %v3341_v13 = vld [vmem:[%s4262_s3 + $0x1f0] ss:$8 sps:$4 sm:$0xff]  }
  0x25   : > { %1078 = vmatpush1.bf16.msra.mxu0 %v3260_v14  ;;  %v3346_v14 = vld [vmem:[%s4262_s3 + $0x204] ss:$8 sps:$4 sm:$0xff]  }
  0x26   : > { %1079 = vmatprep.subr.bf16.mxu0 %v3265_v15  ;;  %v477_v15 = vpack.c.bf16 %v3568_v4, %v3568_v4  ;;  %v3352_v4 = vld [vmem:[%s4262_s3 + $0x224] ss:$8 sps:$4 sm:$0xff]  }
  0x29   : > { %1080 = vmatpush1.bf16.msra.mxu0 %v3263_v16  ;;  %v3344_v16 = vld [vmem:[%s4262_s3 + $0x200] ss:$8 sps:$4 sm:$0xff]  }
  0x2a   : > { %1081 = vmatprep.subr.bf16.mxu0 %v3268_v17 }
  0x2d   : > { %1082 = vmatpush1.bf16.msra.mxu0 %v3266_v18  ;;  %v3349_v18 = vld [vmem:[%s4262_s3 + $0x214] ss:$8 sps:$4 sm:$0xff]  }
  0x2e   : > { %1083 = vmatprep.subr.bf16.mxu0 %v3271_v19  ;;  %v3347_v19 = vld [vmem:[%s4262_s3 + $0x210] ss:$8 sps:$4 sm:$0xff]  }
  0x31   : > { %1084 = vmatpush1.bf16.msra.mxu0 %v3269_v20  ;;  %v3350_v20 = vld [vmem:[%s4262_s3 + $0x220] ss:$8 sps:$4 sm:$0xff]  }
  0x32   : > { %1085 = vmatprep.subr.bf16.mxu0 %v3274_v21  ;;  %v3355_v21 = vld [vmem:[%s4262_s3 + $0x234] ss:$8 sps:$4 sm:$0xff]  }
  0x35   : > { %1086 = vmatpush1.bf16.msra.mxu0 %v3272_v22  ;;  %v3353_v22 = vld [vmem:[%s4262_s3 + $0x230] ss:$8 sps:$4 sm:$0xff]  }
  0x36   : > { %1087 = vmatprep.subr.bf16.mxu0 %v3277_v23  ;;  %v3358_v23 = vld [vmem:[%s4262_s3 + $0x244] ss:$8 sps:$4 sm:$0xff]  }
  0x39   : > { %1088 = vmatpush1.bf16.msra.mxu0 %v3275_v24  ;;  %v3356_v24 = vld [vmem:[%s4262_s3 + $0x240] ss:$8 sps:$4 sm:$0xff]  }
  0x3a   : > { %1089 = vmatprep.subr.bf16.mxu0 %v3280_v25  ;;  %v3361_v25 = vld [vmem:[%s4262_s3 + $0x254] ss:$8 sps:$4 sm:$0xff]  }
  0x3d   : > { %1090 = vmatpush1.bf16.msra.mxu0 %v3278_v26  ;;  %v3359_v26 = vld [vmem:[%s4262_s3 + $0x250] ss:$8 sps:$4 sm:$0xff]  }
  0x3e   : > { %1091 = vmatprep.subr.bf16.mxu0 %v3283_v27  ;;  %v3364_v27 = vld [vmem:[%s4262_s3 + $0x264] ss:$8 sps:$4 sm:$0xff]  }
  0x41   : > { %1092 = vmatpush1.bf16.msra.mxu0 %v3281_v28  ;;  %v3362_v28 = vld [vmem:[%s4262_s3 + $0x260] ss:$8 sps:$4 sm:$0xff]  }
  0x42   : > { %1093 = vmatprep.subr.bf16.mxu0 %v3286_v29  ;;  %v3367_v29 = vld [vmem:[%s4262_s3 + $0x274] ss:$8 sps:$4 sm:$0xff]  }
  0x45   : > { %1094 = vmatpush1.bf16.msra.mxu0 %v3284_v30  ;;  %v3365_v30 = vld [vmem:[%s4262_s3 + $0x270] ss:$8 sps:$4 sm:$0xff]  }
  0x46   : > { %1095 = vmatprep.subr.bf16.mxu0 %v3289_v31  ;;  %v3370_v31 = vld [vmem:[%s4262_s3 + $0x284] ss:$8 sps:$4 sm:$0xff]  }
  0x49   : > { %1096 = vmatpush1.bf16.msra.mxu0 %v3287_v32  ;;  %v3368_v32 = vld [vmem:[%s4262_s3 + $0x280] ss:$8 sps:$4 sm:$0xff]  }
  0x4a   : > { %1097 = vmatprep.subr.bf16.mxu0 %v3292_v33  ;;  %v3373_v33 = vld [vmem:[%s4262_s3 + $0x294] ss:$8 sps:$4 sm:$0xff]  }
  0x4d   : > { %1098 = vmatpush1.bf16.msra.mxu0 %v3290_v34  ;;  %v3371_v34 = vld [vmem:[%s4262_s3 + $0x290] ss:$8 sps:$4 sm:$0xff]  }
  0x4e   : > { %1099 = vmatprep.subr.bf16.mxu0 %v3295_v35  ;;  %v3376_v35 = vld [vmem:[%s4262_s3 + $0x2a4] ss:$8 sps:$4 sm:$0xff]  }
  0x51   : > { %1100 = vmatpush1.bf16.msra.mxu0 %v3293_v36  ;;  %v3374_v36 = vld [vmem:[%s4262_s3 + $0x2a0] ss:$8 sps:$4 sm:$0xff]  }
  0x52   : > { %1110 = vmatprep.subr.bf16.mxu0 %v3298_v37  ;;  %v3379_v37 = vld [vmem:[%s4262_s3 + $0x2b4] ss:$8 sps:$4 sm:$0xff]  }
  0xe6   : > { %v396_v38 = vpop.f32.mrb[0].mxu0  ;;  %v3676_v39 = vpop.f32.mrb[0].mxu1 }
  0xe7   : > { %v398_v40 = vpop.f32.mrb[1].mxu0  ;;  %v3678_v41 = vpop.f32.mrb[1].mxu1  ;;  %v475_v45 = vpack.c.bf16 %v396_v38, %v396_v38  ;;  %v3377_v38 = vld [vmem:[%s4262_s3 + $0x2b0] ss:$8 sps:$4 sm:$0xff]  }
  0xe8   : > { %v476_v42 = vpack.c.bf16 %v398_v40, %v398_v40  ;;  %v480_v17 = vpack.c.bf16 %v3678_v41, %v3678_v41  ;;  %v3382_v40 = vld [vmem:[%s4262_s3 + $0x2c4] ss:$8 sps:$4 sm:$0xff]   ;;  %v3380_v41 = vld [vmem:[%s4262_s3 + $0x2c0] ss:$8 sps:$4 sm:$0xff]  }
  0xea   : > { %1101 = vmatprep.mubr.bf16.mxu0 %v476_v42  ;;  %v3385_v42 = vld [vmem:[%s4262_s3 + $0x2d4] ss:$8 sps:$4 sm:$0xff]  }
  0xeb   : > { %1102 = vmatmul.mubr.bf16.vlgmr.msra.gmra.mrb[4].mxu0 %v475_v45  ;;  %v3386_v45 = vld [vmem:[%s4262_s3 + $0x2e0] ss:$8 sps:$4 sm:$0xff]  }
  0xec   : > { %1111 = vmatpush1.bf16.msra.mxu0 %v3296_v43  ;;  %1142 = vmatprep.mubr.bf16.mxu0 %v478_v44  ;;  %v3383_v43 = vld [vmem:[%s4262_s3 + $0x2d0] ss:$8 sps:$4 sm:$0xff]   ;;  %v3388_v44 = vld [vmem:[%s4262_s3 + $0x2e4] ss:$8 sps:$4 sm:$0xff]  }
  0xed   : > { %1112 = vmatprep.subr.bf16.mxu0 %v3301_v46  ;;  %v3391_v46 = vld [vmem:[%s4262_s3 + $0x2f4] ss:$8 sps:$4 sm:$0xff]  }
  0xf0   : > { %1113 = vmatpush1.bf16.msra.mxu0 %v3299_v47  ;;  %v3389_v47 = vld [vmem:[%s4262_s3 + $0x2f0] ss:$8 sps:$4 sm:$0xff]  }
  0xf1   : > { %1114 = vmatprep.subr.bf16.mxu0 %v3304_v48  ;;  %v479_v48 = vpack.c.bf16 %v3676_v39, %v3676_v39  ;;  %v3392_v39 = vld [vmem:[%s4262_s3 + $0x380] ss:$8 sps:$4 sm:$0xff]  }
  0xf4   : > { %1115 = vmatpush1.bf16.msra.mxu0 %v3302_v49  ;;  %v579_v49 = vlaneseq }
  0xf5   : > { %1116 = vmatprep.subr.bf16.mxu0 %v3307_v50 }
  0xf6   : > { %v580_v50 = vshrl.u32 %v579_v49, 7  ;;  %v3429_v49 = vld [vmem:[%s4262_s3 + $0x520] ss:$8 sps:$4 sm:$0xff]  }
  0xf8   : > { %1117 = vmatpush1.bf16.msra.mxu0 %v3305_v51  ;;  %v581_v51 = vsub.s32 0, %v580_v50 }
  0xf9   : > { %1118 = vmatprep.subr.bf16.mxu0 %v3310_v52  ;;  %v577_v52 = vld [vmem:[%s4263_s4] ss:$4 sm:$0x3] }
  0xfc   : > { %1119 = vmatpush1.bf16.msra.mxu0 %v3308_v53  ;;  %v585_v53 = vsub.s32 1, %v580_v50  ;;  %v3430_v50 = vld [vmem:[%s4262_s3 + $0x5b0] ss:$8 sps:$4 sm:$0xff]  }
  0xfd   : > { %1120 = vmatprep.subr.bf16.mxu0 %v3313_v54  ;;  %v582_v54 = vrot.slane %v577_v52, %v581_v51  ;;  %v3431_v51 = vld [vmem:[%s4262_s3 + $0x530] ss:$8 sps:$4 sm:$0xff]  }
 0x100   : > { %1121 = vmatpush1.bf16.msra.mxu0 %v3311_v55  ;;  %v586_v55 = vrot.slane %v577_v52, %v585_v53  ;;  %v3432_v52 = vld [vmem:[%s4262_s3 + $0x5c0] ss:$8 sps:$4 sm:$0xff]  }
 0x101   : > { %1122 = vmatprep.subr.bf16.mxu0 %v3316_v56  ;;  %v3433_v53 = vld [vmem:[%s4262_s3 + $0x540] ss:$8 sps:$4 sm:$0xff]  }
 0x104   : > { %1123 = vmatpush1.bf16.msra.mxu0 %v3314_v57 }
 0x105   : > { %1124 = vmatprep.subr.bf16.mxu0 %v3319_v58 }
 0x108   : > { %1125 = vmatpush1.bf16.msra.mxu0 %v3317_v59 }
 0x109   : > { %1126 = vmatprep.subr.bf16.mxu0 %v3322_v60 }
 0x10c   : > { %1127 = vmatpush1.bf16.msra.mxu0 %v3320_v61 }
 0x10d   : > { %1128 = vmatprep.subr.bf16.mxu0 %v3325_v62 }
 0x110   : > { %1129 = vmatpush1.bf16.msra.mxu0 %v3323_v63 }
 0x111   : > { %1130 = vmatprep.subr.bf16.mxu0 %v3328_v1  ;;  %v3889_v1 = vld [vmem:[%s4264_s5] sm:$0xff] }
 0x114   : > { %1131 = vmatpush1.bf16.msra.mxu0 %v3326_v2  ;;  %v3393_v2 = vld [vmem:[%s4262_s3 + $0x300] ss:$8 sps:$4 sm:$0xff]  }
 0x115   : > { %1132 = vmatprep.subr.bf16.mxu0 %v3331_v3  ;;  %v3394_v3 = vld [vmem:[%s4262_s3 + $0x390] ss:$8 sps:$4 sm:$0xff]  }
 0x118   : > { %1133 = vmatpush1.bf16.msra.mxu0 %v3329_v5  ;;  %v3904_v5 = vld [vmem:[%s4264_s5 + $0x8] sm:$0xff] }
 0x119   : > { %1134 = vmatprep.subr.bf16.mxu0 %v3334_v6  ;;  %v3395_v6 = vld [vmem:[%s4262_s3 + $0x310] ss:$8 sps:$4 sm:$0xff]  }
 0x11c   : > { %1135 = vmatpush1.bf16.msra.mxu0 %v3332_v7  ;;  %v3396_v7 = vld [vmem:[%s4262_s3 + $0x3a0] ss:$8 sps:$4 sm:$0xff]  }
 0x11d   : > { %1136 = vmatprep.subr.bf16.mxu0 %v3337_v8  ;;  %v3397_v8 = vld [vmem:[%s4262_s3 + $0x320] ss:$8 sps:$4 sm:$0xff]  }
 0x120   : > { %1137 = vmatpush1.bf16.msra.mxu0 %v3335_v9  ;;  %v3398_v9 = vld [vmem:[%s4262_s3 + $0x3b0] ss:$8 sps:$4 sm:$0xff]  }
 0x121   : > { %1138 = vmatprep.subr.bf16.mxu0 %v3340_v10  ;;  %v3399_v10 = vld [vmem:[%s4262_s3 + $0x330] ss:$8 sps:$4 sm:$0xff]  }
 0x124   : > { %1139 = vmatpush1.bf16.msra.mxu0 %v3338_v11  ;;  %v3400_v11 = vld [vmem:[%s4262_s3 + $0x3c0] ss:$8 sps:$4 sm:$0xff]  }
 0x125   : > { %1140 = vmatprep.subr.bf16.mxu0 %v3343_v12  ;;  %v3401_v12 = vld [vmem:[%s4262_s3 + $0x340] ss:$8 sps:$4 sm:$0xff]  }
 0x128   : > { %1141 = vmatpush1.bf16.msra.mxu0 %v3341_v13  ;;  %v3402_v13 = vld [vmem:[%s4262_s3 + $0x3d0] ss:$8 sps:$4 sm:$0xff]  }
 0x129   : > { %1151 = vmatprep.subr.bf16.mxu0 %v3346_v14  ;;  %v3403_v14 = vld [vmem:[%s4262_s3 + $0x350] ss:$8 sps:$4 sm:$0xff]  }
 0x12b   : > { %1143 = vmatmul.mubr.bf16.vlgmr.msra.gmra.mrb[4].mxu0 %v477_v15  ;;  %v3404_v15 = vld [vmem:[%s4262_s3 + $0x3e0] ss:$8 sps:$4 sm:$0xff]  }
 0x12c   : > { %1152 = vmatpush1.bf16.msra.mxu0 %v3344_v16  ;;  %1183 = vmatprep.mubr.bf16.mxu0 %v480_v17  ;;  %v3405_v16 = vld [vmem:[%s4262_s3 + $0x360] ss:$8 sps:$4 sm:$0xff]   ;;  %v3406_v17 = vld [vmem:[%s4262_s3 + $0x3f0] ss:$8 sps:$4 sm:$0xff]  }
 0x12d   : > { %1153 = vmatprep.subr.bf16.mxu0 %v3349_v18  ;;  %v3407_v18 = vld [vmem:[%s4262_s3 + $0x370] ss:$8 sps:$4 sm:$0xff]  }
 0x130   : > { %1154 = vmatpush1.bf16.msra.mxu0 %v3347_v19  ;;  %v3408_v19 = vld [vmem:[%s4262_s3 + $0x480] ss:$8 sps:$4 sm:$0xff]  }
 0x131   : > { %1155 = vmatprep.subr.bf16.mxu0 %v3352_v4 }
 0x134   : > { %1156 = vmatpush1.bf16.msra.mxu0 %v3350_v20 }
 0x135   : > { %1157 = vmatprep.subr.bf16.mxu0 %v3355_v21 }
 0x138   : > { %1158 = vmatpush1.bf16.msra.mxu0 %v3353_v22  ;;  %v3409_v22 = vld [vmem:[%s4262_s3 + $0x400] ss:$8 sps:$4 sm:$0xff]  }
 0x139   : > { %1159 = vmatprep.subr.bf16.mxu0 %v3358_v23 }
 0x13c   : > { %1160 = vmatpush1.bf16.msra.mxu0 %v3356_v24  ;;  %v3410_v24 = vld [vmem:[%s4262_s3 + $0x490] ss:$8 sps:$4 sm:$0xff]  }
 0x13d   : > { %1161 = vmatprep.subr.bf16.mxu0 %v3361_v25 }
 0x140   : > { %1162 = vmatpush1.bf16.msra.mxu0 %v3359_v26 }
 0x141   : > { %1163 = vmatprep.subr.bf16.mxu0 %v3364_v27 }
 0x144   : > { %1164 = vmatpush1.bf16.msra.mxu0 %v3362_v28  ;;  %v3411_v28 = vld [vmem:[%s4262_s3 + $0x410] ss:$8 sps:$4 sm:$0xff]  }
 0x145   : > { %1165 = vmatprep.subr.bf16.mxu0 %v3367_v29  ;;  %v3412_v29 = vld [vmem:[%s4262_s3 + $0x4a0] ss:$8 sps:$4 sm:$0xff]  }
 0x148   : > { %1166 = vmatpush1.bf16.msra.mxu0 %v3365_v30  ;;  %v3413_v30 = vld [vmem:[%s4262_s3 + $0x420] ss:$8 sps:$4 sm:$0xff]  }
 0x149   : > { %1167 = vmatprep.subr.bf16.mxu0 %v3370_v31  ;;  %v3414_v31 = vld [vmem:[%s4262_s3 + $0x4b0] ss:$8 sps:$4 sm:$0xff]  }
 0x14c   : > { %1168 = vmatpush1.bf16.msra.mxu0 %v3368_v32  ;;  %v3415_v32 = vld [vmem:[%s4262_s3 + $0x430] ss:$8 sps:$4 sm:$0xff]  }
 0x14d   : > { %1169 = vmatprep.subr.bf16.mxu0 %v3373_v33  ;;  %v3416_v33 = vld [vmem:[%s4262_s3 + $0x4c0] ss:$8 sps:$4 sm:$0xff]  }
 0x150   : > { %1170 = vmatpush1.bf16.msra.mxu0 %v3371_v34  ;;  %v3417_v34 = vld [vmem:[%s4262_s3 + $0x440] ss:$8 sps:$4 sm:$0xff]  }
 0x151   : > { %1171 = vmatprep.subr.bf16.mxu0 %v3376_v35  ;;  %v3418_v35 = vld [vmem:[%s4262_s3 + $0x4d0] ss:$8 sps:$4 sm:$0xff]  }
 0x154   : > { %1172 = vmatpush1.bf16.msra.mxu0 %v3374_v36  ;;  %v3419_v36 = vld [vmem:[%s4262_s3 + $0x450] ss:$8 sps:$4 sm:$0xff]  }
 0x155   : > { %1173 = vmatprep.subr.bf16.mxu0 %v3379_v37  ;;  %v3420_v37 = vld [vmem:[%s4262_s3 + $0x4e0] ss:$8 sps:$4 sm:$0xff]  }
 0x158   : > { %1174 = vmatpush1.bf16.msra.mxu0 %v3377_v38  ;;  %v3421_v38 = vld [vmem:[%s4262_s3 + $0x460] ss:$8 sps:$4 sm:$0xff]  }
 0x159   : > { %1175 = vmatprep.subr.bf16.mxu0 %v3382_v40  ;;  %v3422_v40 = vld [vmem:[%s4262_s3 + $0x4f0] ss:$8 sps:$4 sm:$0xff]  }
 0x15c   : > { %1176 = vmatpush1.bf16.msra.mxu0 %v3380_v41  ;;  %v3423_v41 = vld [vmem:[%s4262_s3 + $0x470] ss:$8 sps:$4 sm:$0xff]  }
 0x15d   : > { %1177 = vmatprep.subr.bf16.mxu0 %v3385_v42  ;;  %v3424_v42 = vld [vmem:[%s4262_s3 + $0x580] ss:$8 sps:$4 sm:$0xff]  }
 0x160   : > { %1178 = vmatpush1.bf16.msra.mxu0 %v3383_v43  ;;  %v3425_v43 = vld [vmem:[%s4262_s3 + $0x500] ss:$8 sps:$4 sm:$0xff]  }
 0x161   : > { %1179 = vmatprep.subr.bf16.mxu0 %v3388_v44 }
 0x164   : > { %1180 = vmatpush1.bf16.msra.mxu0 %v3386_v45 }
 0x165   : > { %1181 = vmatprep.subr.bf16.mxu0 %v3391_v46  ;;  %v3426_v46 = vld [vmem:[%s4262_s3 + $0x590] ss:$8 sps:$4 sm:$0xff]  }
 0x168   : > { %1182 = vmatpush1.bf16.msra.mxu0 %v3389_v47  ;;  %v3427_v47 = vld [vmem:[%s4262_s3 + $0x510] ss:$8 sps:$4 sm:$0xff]  }
 0x16b   : > { %1184 = vmatmul.mubr.bf16.vlgmr.msra.gmra.mrb[4].mxu0 %v479_v48  ;;  %v3428_v48 = vld [vmem:[%s4262_s3 + $0x5a0] ss:$8 sps:$4 sm:$0xff]  }
 0x23e   : > { %v1185_v56 = vpop.f32.mrb[4].mxu0 }
 0x23f   : > { %v3228_v57 = vadd.f32 %v1185_v56, %v582_v54  ;;  %v1187_v58 = vpop.f32.mrb[5].mxu0  ;;  %v3434_v54 = vld [vmem:[%s4262_s3 + $0x5d0] ss:$8 sps:$4 sm:$0xff]   ;;  %v3436_v56 = vld [vmem:[%s4262_s3 + $0x5e0] ss:$8 sps:$4 sm:$0xff]  }
 0x240   : > { %v3229_v59 = vadd.f32 %v1187_v58, %v586_v55  ;;  %v1189_v60 = vpop.f32.mrb[6].mxu0  ;;  %v3435_v55 = vld [vmem:[%s4262_s3 + $0x550] ss:$8 sps:$4 sm:$0xff]  }
 0x241   : > { %v1190_v61 = vpop.f32.mrb[7].mxu0  ;;  %v3880_v63 = vmax.f32 %v3228_v57, 0.0  ;;  %v3437_v57 = vld [vmem:[%s4262_s3 + $0x560] ss:$8 sps:$4 sm:$0xff]   ;;  %v3438_v58 = vld [vmem:[%s4262_s3 + $0x5f0] ss:$8 sps:$4 sm:$0xff]  }
 0x242   : > { %v1193_v62 = vmax.f32 %v3229_v59, 0.0  ;;  %v3439_v59 = vld [vmem:[%s4262_s3 + $0x570] ss:$8 sps:$4 sm:$0xff]  }
 0x243   : > { %v1338_v45 = vpack.c.bf16 %v3880_v63, %v3880_v63 }
 0x244   : > { %1194 = vmatprep.subr.mxu1 %v1193_v62  ;;  %v1339_v25 = vpack.c.bf16 %v1193_v62, %v1193_v62 }
 0x245   : > { %1195 = vmatpush1.msra.mxu1 %v3880_v63 }
 0x246   : > { %2923 = vmatmul.mubr.msk.f32.vlgmr.msra.gmra.mrb[2].mxu1 %vm326_vm0, %v3889_v1  ;;  %1265 = vmatprep.subr.mxu1 %v1193_v62 }
 0x247   : > { %1266 = vmatpush1.msra.mxu1 %v3880_v63  ;;  %1329 = vmatprep.mubr.f32.mxu1 %v3502_v0 }
 0x248   : > { %3032 = vmatprep.subr.bf16.mxu1 %v3392_v39 }
 0x24a   : > { %2924 = vmatmul.mubr.msk.f32.vlgmr.msra.gmra.mrb[4].mxu1 %vm326_vm0, %v3904_v5 }
 0x24b   : > { %3033 = vmatpush3.bf16.msra.mxu1 %v3393_v2 }
 0x24c   : > { %3034 = vmatprep.subr.bf16.mxu1 %v3394_v3  ;;  %v2925_v3 = vld [vmem:[%s4263_s4 + $0x1] ss:$0 sm:$0xff] }
 0x24f   : > { %3035 = vmatpush3.bf16.msra.mxu1 %v3395_v6 }
 0x250   : > { %3036 = vmatprep.subr.bf16.mxu1 %v3396_v7 }
 0x253   : > { %3037 = vmatpush3.bf16.msra.mxu1 %v3397_v8 }
 0x254   : > { %3038 = vmatprep.subr.bf16.mxu1 %v3398_v9 }
 0x257   : > { %3039 = vmatpush3.bf16.msra.mxu1 %v3399_v10 }
 0x258   : > { %3040 = vmatprep.subr.bf16.mxu1 %v3400_v11 }
 0x25b   : > { %3041 = vmatpush3.bf16.msra.mxu1 %v3401_v12 }
 0x25c   : > { %3042 = vmatprep.subr.bf16.mxu1 %v3402_v13 }
 0x25f   : > { %3043 = vmatpush3.bf16.msra.mxu1 %v3403_v14 }
 0x260   : > { %3044 = vmatprep.subr.bf16.mxu1 %v3404_v15 }
 0x263   : > { %3045 = vmatpush3.bf16.msra.mxu1 %v3405_v16 }
 0x264   : > { %3046 = vmatprep.subr.bf16.mxu1 %v3406_v17 }
 0x267   : > { %3047 = vmatpush3.bf16.msra.mxu1 %v3407_v18 }
 0x268   : > { %3054 = vmatprep.subr.bf16.mxu1 %v3408_v19 }
 0x319   : > { %v1260_v4 = vpop.f32.mrb[2].mxu1 }
 0x31a   : > { %v1262_v20 = vpop.f32.mrb[3].mxu1  ;;  %v1336_v23 = vpack.c.bf16 %v1260_v4, %v1260_v4  ;;  %v3440_v4 = vld [vmem:[%s4262_s3 + $0x680] ss:$8 sps:$4 sm:$0xff]  }
 0x31b   : > { %v1337_v21 = vpack.c.bf16 %v1262_v20, %v1262_v20  ;;  %v3441_v20 = vld [vmem:[%s4262_s3 + $0x600] ss:$8 sps:$4 sm:$0xff]  }
 0x31d   : > { %1763 = vmatprep.mubr.bf16.mxu1 %v1337_v21  ;;  %v3956_v26 = vpop.f32.mrb[4].mxu1  ;;  %v3442_v21 = vld [vmem:[%s4262_s3 + $0x690] ss:$8 sps:$4 sm:$0xff]  }
 0x31e   : > { %1764 = vmatmul.mubr.bf16.vlgmr.msra.gmra.mrb[8].mxu1 %v1336_v23  ;;  %v1333_v27 = vpop.f32.mrb[5].mxu1  ;;  %v1340_v60 = vpack.c.bf16 %v3956_v26, %v3956_v26  ;;  %v3443_v23 = vld [vmem:[%s4262_s3 + $0x610] ss:$8 sps:$4 sm:$0xff]  }
 0x31f   : > { %3055 = vmatpush3.bf16.msra.mxu1 %v3409_v22  ;;  %1803 = vmatprep.mubr.bf16.mxu1 %v1339_v25  ;;  %v1341_v44 = vpack.c.bf16 %v1333_v27, %v1333_v27  ;;  %v3445_v25 = vld [vmem:[%s4262_s3 + $0x620] ss:$8 sps:$4 sm:$0xff]   ;;  %v3446_v26 = vld [vmem:[%s4262_s3 + $0x6b0] ss:$8 sps:$4 sm:$0xff]  }
 0x320   : > { %3056 = vmatprep.subr.bf16.mxu1 %v3410_v24  ;;  %v3444_v24 = vld [vmem:[%s4262_s3 + $0x6a0] ss:$8 sps:$4 sm:$0xff]   ;;  %v3447_v27 = vld [vmem:[%s4262_s3 + $0x630] ss:$8 sps:$4 sm:$0xff]  }
 0x323   : > { %3057 = vmatpush3.bf16.msra.mxu1 %v3411_v28  ;;  %v3448_v28 = vld [vmem:[%s4262_s3 + $0x6c0] ss:$8 sps:$4 sm:$0xff]  }
 0x324   : > { %3058 = vmatprep.subr.bf16.mxu1 %v3412_v29  ;;  %v3449_v29 = vld [vmem:[%s4262_s3 + $0x640] ss:$8 sps:$4 sm:$0xff]  }
 0x327   : > { %3059 = vmatpush3.bf16.msra.mxu1 %v3413_v30  ;;  %v3450_v30 = vld [vmem:[%s4262_s3 + $0x6d0] ss:$8 sps:$4 sm:$0xff]  }
 0x328   : > { %3060 = vmatprep.subr.bf16.mxu1 %v3414_v31  ;;  %v3451_v31 = vld [vmem:[%s4262_s3 + $0x650] ss:$8 sps:$4 sm:$0xff]  }
 0x32b   : > { %3061 = vmatpush3.bf16.msra.mxu1 %v3415_v32  ;;  %v3452_v32 = vld [vmem:[%s4262_s3 + $0x6e0] ss:$8 sps:$4 sm:$0xff]  }
 0x32c   : > { %3062 = vmatprep.subr.bf16.mxu1 %v3416_v33  ;;  %v3453_v33 = vld [vmem:[%s4262_s3 + $0x660] ss:$8 sps:$4 sm:$0xff]  }
 0x32f   : > { %3063 = vmatpush3.bf16.msra.mxu1 %v3417_v34  ;;  %v3454_v34 = vld [vmem:[%s4262_s3 + $0x6f0] ss:$8 sps:$4 sm:$0xff]  }
 0x330   : > { %3064 = vmatprep.subr.bf16.mxu1 %v3418_v35  ;;  %v3455_v35 = vld [vmem:[%s4262_s3 + $0x670] ss:$8 sps:$4 sm:$0xff]  }
 0x333   : > { %3065 = vmatpush3.bf16.msra.mxu1 %v3419_v36 }
 0x334   : > { %3066 = vmatprep.subr.bf16.mxu1 %v3420_v37  ;;  %v3456_v37 = vld [vmem:[%s4262_s3 + $0x700] ss:$8 sps:$4 sm:$0xff]  }
 0x337   : > { %3067 = vmatpush3.bf16.msra.mxu1 %v3421_v38 }
 0x338   : > { %3068 = vmatprep.subr.bf16.mxu1 %v3422_v40 }
 0x33b   : > { %3069 = vmatpush3.bf16.msra.mxu1 %v3423_v41  ;;  %v3457_v41 = vld [vmem:[%s4262_s3 + $0x710] ss:$8 sps:$4 sm:$0xff]  }
 0x33c   : > { %3076 = vmatprep.subr.bf16.mxu1 %v3424_v42 }
 0x33e   : > { %1804 = vmatmul.mubr.bf16.vlgmr.msra.gmra.mrb[12].mxu1 %v1338_v45  ;;  %v3459_v45 = vld [vmem:[%s4262_s3 + $0x730] ss:$8 sps:$4 sm:$0xff]  }
 0x33f   : > { %3077 = vmatpush3.bf16.msra.mxu1 %v3425_v43  ;;  %1843 = vmatprep.mubr.bf16.mxu1 %v1341_v44  ;;  %v3458_v44 = vld [vmem:[%s4262_s3 + $0x720] ss:$8 sps:$4 sm:$0xff]  }
 0x340   : > { %3078 = vmatprep.subr.bf16.mxu1 %v3426_v46  ;;  %v3460_v46 = vld [vmem:[%s4262_s3 + $0x740] ss:$8 sps:$4 sm:$0xff]  }
 0x343   : > { %3079 = vmatpush3.bf16.msra.mxu1 %v3427_v47  ;;  %v3461_v47 = vld [vmem:[%s4262_s3 + $0x750] ss:$8 sps:$4 sm:$0xff]  }
 0x344   : > { %3080 = vmatprep.subr.bf16.mxu1 %v3428_v48  ;;  %v3462_v48 = vld [vmem:[%s4262_s3 + $0x760] ss:$8 sps:$4 sm:$0xff]  }
 0x347   : > { %3081 = vmatpush3.bf16.msra.mxu1 %v3429_v49  ;;  %v3463_v49 = vld [vmem:[%s4262_s3 + $0x770] ss:$8 sps:$4 sm:$0xff]  }
 0x348   : > { %3082 = vmatprep.subr.bf16.mxu1 %v3430_v50 }
 0x34b   : > { %3083 = vmatpush3.bf16.msra.mxu1 %v3431_v51  ;;  %v3464_v51 = vld [vmem:[%s4262_s3 + $0x800] ss:$8 sps:$4 sm:$0xff]  }
 0x34c   : > { %3084 = vmatprep.subr.bf16.mxu1 %v3432_v52  ;;  %v3465_v52 = vld [vmem:[%s4262_s3 + $0x780] ss:$8 sps:$4 sm:$0xff]   ;;  %3137 = vmatprep.subr.bf16.mxu0 %v3464_v51 }
 0x34d   : > { %3138 = vmatpush3.bf16.msra.mxu0 %v3465_v52 }
 0x34f   : > { %3085 = vmatpush3.bf16.msra.mxu1 %v3433_v53  ;;  %v3466_v53 = vld [vmem:[%s4262_s3 + $0x810] ss:$8 sps:$4 sm:$0xff]  }
 0x350   : > { %3086 = vmatprep.subr.bf16.mxu1 %v3434_v54  ;;  %v3467_v54 = vld [vmem:[%s4262_s3 + $0x790] ss:$8 sps:$4 sm:$0xff]   ;;  %3139 = vmatprep.subr.bf16.mxu0 %v3466_v53 }
 0x351   : > { %3140 = vmatpush3.bf16.msra.mxu0 %v3467_v54 }
 0x353   : > { %3087 = vmatpush3.bf16.msra.mxu1 %v3435_v55  ;;  %v3469_v55 = vld [vmem:[%s4262_s3 + $0x820] ss:$8 sps:$4 sm:$0xff]  }
 0x354   : > { %3088 = vmatprep.subr.bf16.mxu1 %v3436_v56  ;;  %v3470_v56 = vld [vmem:[%s4262_s3 + $0x7a0] ss:$8 sps:$4 sm:$0xff]   ;;  %3141 = vmatprep.subr.bf16.mxu0 %v3469_v55 }
 0x355   : > { %3142 = vmatpush3.bf16.msra.mxu0 %v3470_v56 }
 0x357   : > { %3089 = vmatpush3.bf16.msra.mxu1 %v3437_v57  ;;  %v3472_v57 = vld [vmem:[%s4262_s3 + $0x830] ss:$8 sps:$4 sm:$0xff]  }
 0x358   : > { %3090 = vmatprep.subr.bf16.mxu1 %v3438_v58  ;;  %v3473_v58 = vld [vmem:[%s4262_s3 + $0x7b0] ss:$8 sps:$4 sm:$0xff]   ;;  %3143 = vmatprep.subr.bf16.mxu0 %v3472_v57 }
 0x359   : > { %3144 = vmatpush3.bf16.msra.mxu0 %v3473_v58 }
 0x35b   : > { %3091 = vmatpush3.bf16.msra.mxu1 %v3439_v59  ;;  %v3475_v59 = vld [vmem:[%s4262_s3 + $0x840] ss:$8 sps:$4 sm:$0xff]  }
 0x35c   : > { %3168 = vmatprep.subr.mxu1 %v3502_v0  ;;  %3145 = vmatprep.subr.bf16.mxu0 %v3475_v59 }
 0x35e   : > { %1844 = vmatmul.mubr.bf16.vlgmr.msra.gmra.mrb[16].mxu1 %v1340_v60  ;;  %v3476_v60 = vld [vmem:[%s4262_s3 + $0x7c0] ss:$8 sps:$4 sm:$0xff]  }
 0x35f   : > { %3170 = vmatprep.mubr.msk.f32.mxu1 %vm3503_vm1, %v3502_v0  ;;  %3146 = vmatpush3.bf16.msra.mxu0 %v3476_v60 }
 0x3f1   : > { %v3048_v61 = vpop.f32.mrb[8].mxu1 }
 0x3f2   : > { %v3049_v62 = vpop.f32.mrb[9].mxu1 }
 0x3f3   : > { %v3050_v63 = vadd.f32 %v3049_v62, %v3048_v61  ;;  %v3051_v39 = vpop.f32.mrb[10].mxu1  ;;  %v3478_v61 = vld [vmem:[%s4262_s3 + $0x850] ss:$8 sps:$4 sm:$0xff]  }
 0x3f4   : > { %v3052_v2 = vpop.f32.mrb[11].mxu1  ;;  %v3479_v62 = vld [vmem:[%s4262_s3 + $0x7d0] ss:$8 sps:$4 sm:$0xff]   ;;  %3147 = vmatprep.subr.bf16.mxu0 %v3478_v61  ;;  %v3482_v39 = vld [vmem:[%s4262_s3 + $0x7e0] ss:$8 sps:$4 sm:$0xff]  }
 0x3f5   : > { %v1766_v8 = vadd.f32 %v3050_v63, %v2925_v3  ;;  %v3481_v63 = vld [vmem:[%s4262_s3 + $0x860] ss:$8 sps:$4 sm:$0xff]   ;;  %3148 = vmatpush3.bf16.msra.mxu0 %v3479_v62  ;;  %v3484_v2 = vld [vmem:[%s4262_s3 + $0x870] ss:$8 sps:$4 sm:$0xff]  }
 0x3f6   : > { %3149 = vmatprep.subr.bf16.mxu0 %v3481_v63 }
 0x3f9   : > { %3150 = vmatpush3.bf16.msra.mxu0 %v3482_v39 }
 0x3fa   : > { %3151 = vmatprep.subr.bf16.mxu0 %v3484_v2 }
 0x411   : > { %v3070_v6 = vpop.f32.mrb[12].mxu1 }
 0x412   : > { %v3071_v7 = vpop.f32.mrb[13].mxu1 }
 0x413   : > { %v3072_v9 = vadd.f32 %v3071_v7, %v3070_v6  ;;  %v3073_v10 = vpop.f32.mrb[14].mxu1 }
 0x414   : > { %v3074_v11 = vpop.f32.mrb[15].mxu1  ;;  %v2976_v10 = vld [vmem:[%s4263_s4 + $0x2] ss:$0 sm:$0xff] }
 0x415   : > { %v1806_v12 = vadd.f32 %v3072_v9, %v1766_v8 }
 0x431   : > { %v3092_v13 = vpop.f32.mrb[16].mxu1 }
 0x432   : > { %v3093_v14 = vpop.f32.mrb[17].mxu1 }
 0x433   : > { %v3094_v15 = vadd.f32 %v3093_v14, %v3092_v13  ;;  %v3095_v16 = vpop.f32.mrb[18].mxu1 }
 0x434   : > { %v3096_v17 = vpop.f32.mrb[19].mxu1 }
 0x435   : > { %v1846_v18 = vadd.f32 %v3094_v15, %v1806_v12 }
 0x437   : > { %v1851_v19 = vmax.f32 %v1846_v18, 0.0 }
 0x439   : > { %3169 = vmatpush3.msra.mxu1 %v1851_v19  ;;  %v1993_v22 = vpack.c.bf16 %v1851_v19, %v1851_v19 }
 0x43a   : > { %3171 = vmatmul.mubr.msk.f32.vlgmr.msra.gmra.mrb[6].mxu1 %vm326_vm0, %v3889_v1  ;;  %3173 = vmatprep.subr.mxu1 %v3502_v0 }
 0x43b   : > { %3174 = vmatpush3.msra.mxu1 %v1851_v19  ;;  %3175 = vmatprep.mubr.msk.f32.mxu1 %vm3503_vm1, %v3502_v0  ;;  %v3468_v19 = vld [vmem:[%s4262_s3 + $0x880] ss:$8 sps:$4 sm:$0xff]  }
 0x43c   : > { %3102 = vmatprep.subr.bf16.mxu1 %v3440_v4  ;;  %v3474_v4 = vld [vmem:[%s4262_s3 + $0x8a0] ss:$8 sps:$4 sm:$0xff]  }
 0x43e   : > { %3176 = vmatmul.mubr.msk.f32.vlgmr.msra.gmra.mrb[20].mxu1 %vm326_vm0, %v3904_v5 }
 0x43f   : > { %2224 = vmatprep.mubr.bf16.mxu1 %v1993_v22  ;;  %3103 = vmatpush3.bf16.msra.mxu1 %v3441_v20  ;;  %v3480_v20 = vld [vmem:[%s4262_s3 + $0x8c0] ss:$8 sps:$4 sm:$0xff]   ;;  %v3485_v22 = vld [vmem:[%s4262_s3 + $0x7f0] ss:$8 sps:$4 sm:$0xff]  }
 0x440   : > { %3104 = vmatprep.subr.bf16.mxu1 %v3442_v21  ;;  %v3483_v21 = vld [vmem:[%s4262_s3 + $0x8d0] ss:$8 sps:$4 sm:$0xff]   ;;  %3152 = vmatpush3.bf16.msra.mxu0 %v3485_v22 }
 0x443   : > { %3105 = vmatpush3.bf16.msra.mxu1 %v3443_v23  ;;  %v3486_v23 = vld [vmem:[%s4262_s3 + $0x8e0] ss:$8 sps:$4 sm:$0xff]  }
 0x444   : > { %3106 = vmatprep.subr.bf16.mxu1 %v3444_v24  ;;  %v3487_v24 = vld [vmem:[%s4262_s3 + $0x8f0] ss:$8 sps:$4 sm:$0xff]  }
 0x447   : > { %3107 = vmatpush3.bf16.msra.mxu1 %v3445_v25 }
 0x448   : > { %3108 = vmatprep.subr.bf16.mxu1 %v3446_v26 }
 0x44b   : > { %3109 = vmatpush3.bf16.msra.mxu1 %v3447_v27 }
 0x44c   : > { %3110 = vmatprep.subr.bf16.mxu1 %v3448_v28 }
 0x44f   : > { %3111 = vmatpush3.bf16.msra.mxu1 %v3449_v29 }
 0x450   : > { %3112 = vmatprep.subr.bf16.mxu1 %v3450_v30 }
 0x453   : > { %3113 = vmatpush3.bf16.msra.mxu1 %v3451_v31 }
 0x454   : > { %3114 = vmatprep.subr.bf16.mxu1 %v3452_v32 }
 0x457   : > { %3115 = vmatpush3.bf16.msra.mxu1 %v3453_v33 }
 0x458   : > { %3116 = vmatprep.subr.bf16.mxu1 %v3454_v34 }
 0x45b   : > { %3117 = vmatpush3.bf16.msra.mxu1 %v3455_v35 }
 0x45c   : > { %3178 = vmatprep.subr.bf16.mxu1 %v3502_v0 }
 0x50d   : > { %v1918_v36 = vpop.f32.mrb[6].mxu1 }
 0x50e   : > { %v1992_v38 = vpack.c.bf16 %v1918_v36, %v1918_v36  ;;  %v3172_v40 = vpop.f32.mrb[7].mxu1 }
 0x510   : > { %2225 = vmatmul.mubr.bf16.vlgmr.msra.gmra.mrb[24].mxu1 %v1992_v38 }
 0x511   : > { %3179 = vmatpush3.bf16.msra.mxu1 %v3456_v37  ;;  %v1988_v42 = vpop.f32.mrb[20].mxu1  ;;  %3194 = vmatprep.mubr.msk.bf16.mxu1 %vm3503_vm1, %v3502_v0 }
 0x512   : > { %3180 = vmatprep.subr.bf16.mxu1 %v3502_v0  ;;  %v3177_v43 = vpop.f32.mrb[21].mxu1  ;;  %v1994_v50 = vpack.c.bf16 %v1988_v42, %v1988_v42 }
 0x515   : > { %3181 = vmatpush3.bf16.msra.mxu1 %v3457_v41 }
 0x516   : > { %3182 = vmatprep.subr.bf16.mxu1 %v3502_v0 }
 0x519   : > { %3183 = vmatpush3.bf16.msra.mxu1 %v3458_v44 }
 0x51a   : > { %3184 = vmatprep.subr.bf16.mxu1 %v3502_v0 }
 0x51d   : > { %3185 = vmatpush3.bf16.msra.mxu1 %v3459_v45 }
 0x51e   : > { %3186 = vmatprep.subr.bf16.mxu1 %v3502_v0 }
 0x521   : > { %3187 = vmatpush3.bf16.msra.mxu1 %v3460_v46  ;;  %v2700_v46 = vld [vmem:[%s308_s11] sm:$0xff] }
 0x522   : > { %3188 = vmatprep.subr.bf16.mxu1 %v3502_v0 }
 0x525   : > { %3189 = vmatpush3.bf16.msra.mxu1 %v3461_v47  ;;  %v2701_v47 = vld [vmem:[%s312_s14] sm:$0xff] }
 0x526   : > { %3190 = vmatprep.subr.bf16.mxu1 %v3502_v0 }
 0x529   : > { %3191 = vmatpush3.bf16.msra.mxu1 %v3462_v48  ;;  %v2702_v48 = vsub.f32 %v2700_v46, %v2701_v47 }
 0x52a   : > { %3192 = vmatprep.subr.bf16.mxu1 %v3502_v0 }
 0x52d   : > { %3193 = vmatpush3.bf16.msra.mxu1 %v3463_v49 }
 0x52e   : > { %3198 = vmatprep.subr.mxu1 %v3502_v0 }
 0x530   : > { %3195 = vmatmul.mubr.bf16.vlgmr.msra.gmra.mrb[28].mxu1 %v1994_v50 }
 0x531   : > { %3200 = vmatprep.mubr.msk.f32.mxu1 %vm3503_vm1, %v3502_v0 }
 0x5e3   : > { %v3118_v3 = vpop.f32.mrb[24].mxu1 }
 0x5e4   : > { %v3119_v6 = vpop.f32.mrb[25].mxu1 }
 0x5e5   : > { %v3120_v7 = vadd.f32 %v3119_v6, %v3118_v3  ;;  %v3121_v8 = vpop.f32.mrb[26].mxu1 }
 0x5e6   : > { %v3122_v9 = vpop.f32.mrb[27].mxu1 }
 0x5e7   : > { %v2227_v11 = vadd.f32 %v3120_v7, %v2976_v10 }
 0x603   : > { %v2266_v12 = vpop.f32.mrb[28].mxu1 }
 0x604   : > { %v2267_v13 = vadd.f32 %v2266_v12, %v2227_v11  ;;  %v3196_v14 = vpop.f32.mrb[29].mxu1 }
 0x605   : > { %v2269_v15 = vpop.f32.mrb[30].mxu1 }
 0x606   : > { %v2272_v16 = vmax.f32 %v2267_v13, 0.0  ;;  %v3197_v17 = vpop.f32.mrb[31].mxu1 }
 0x608   : > { %3199 = vmatpush3.msra.mxu1 %v2272_v16  ;;  %v2414_v18 = vpack.c.bf16 %v2272_v16, %v2272_v16 }
 0x609   : > { %3201 = vmatmul.mubr.msk.f32.vlgmr.msra.gmra.mrb[22].mxu1 %vm326_vm0, %v3889_v1  ;;  %3203 = vmatprep.subr.mxu1 %v3502_v0  ;;  %v3471_v1 = vld [vmem:[%s4262_s3 + $0x890] ss:$8 sps:$4 sm:$0xff]  }
 0x60a   : > { %3204 = vmatpush3.msra.mxu1 %v2272_v16  ;;  %2645 = vmatprep.mubr.bf16.mxu0 %v2414_v18 }
 0x60b   : > { %3205 = vmatprep.mubr.msk.f32.mxu1 %vm3503_vm1, %v3502_v0  ;;  %3208 = vmatprep.subr.bf16.mxu1 %v3502_v0 }
 0x60d   : > { %3206 = vmatmul.mubr.msk.f32.vlgmr.msra.gmra.mrb[32].mxu1 %vm326_vm0, %v3904_v5  ;;  %v3477_v5 = vld [vmem:[%s4262_s3 + $0x8b0] ss:$8 sps:$4 sm:$0xff]  }
 0x60e   : > { %3209 = vmatpush3.bf16.msra.mxu1 %v3468_v19  ;;  %3224 = vmatprep.mubr.msk.bf16.mxu1 %vm3503_vm1, %v3502_v0 }
 0x60f   : > { %3210 = vmatprep.subr.bf16.mxu1 %v3502_v0 }
 0x612   : > { %3211 = vmatpush3.bf16.msra.mxu1 %v3471_v1 }
 0x613   : > { %3212 = vmatprep.subr.bf16.mxu1 %v3502_v0 }
 0x616   : > { %3213 = vmatpush3.bf16.msra.mxu1 %v3474_v4 }
 0x617   : > { %3214 = vmatprep.subr.bf16.mxu1 %v3502_v0 }
 0x61a   : > { %3215 = vmatpush3.bf16.msra.mxu1 %v3477_v5 }
 0x61b   : > { %3216 = vmatprep.subr.bf16.mxu1 %v3502_v0 }
 0x61e   : > { %3217 = vmatpush3.bf16.msra.mxu1 %v3480_v20 }
 0x61f   : > { %3218 = vmatprep.subr.bf16.mxu1 %v3502_v0 }
 0x622   : > { %3219 = vmatpush3.bf16.msra.mxu1 %v3483_v21 }
 0x623   : > { %3220 = vmatprep.subr.bf16.mxu1 %v3502_v0 }
 0x626   : > { %3221 = vmatpush3.bf16.msra.mxu1 %v3486_v23 }
 0x627   : > { %3222 = vmatprep.subr.bf16.mxu1 %v3502_v0  ;;  %v3003_v0 = vld [vmem:[%s4263_s4 + $0x3] ss:$0 sm:$0xff] }
 0x62a   : > { %3223 = vmatpush3.bf16.msra.mxu1 %v3487_v24 }
 0x6dc   : > { %v2339_v25 = vpop.f32.mrb[22].mxu1 }
 0x6dd   : > { %v2413_v26 = vpack.c.bf16 %v2339_v25, %v2339_v25  ;;  %v3202_v27 = vpop.f32.mrb[23].mxu1 }
 0x6df   : > { %2646 = vmatmul.mubr.bf16.vlgmr.msra.gmra.mrb[8].mxu0 %v2413_v26 }
 0x6e0   : > { %v2409_v28 = vpop.f32.mrb[32].mxu1 }
 0x6e1   : > { %v2415_v29 = vpack.c.bf16 %v2409_v28, %v2409_v28  ;;  %v3207_v30 = vpop.f32.mrb[33].mxu1 }
 0x6e3   : > { %3225 = vmatmul.mubr.bf16.vlgmr.msra.gmra.mrb[36].mxu1 %v2415_v29 }
 0x7b2   : > { %v3153_v31 = vpop.f32.mrb[8].mxu0 }
 0x7b3   : > { %v3154_v32 = vpop.f32.mrb[9].mxu0 }
 0x7b4   : > { %v3155_v33 = vadd.f32 %v3154_v32, %v3153_v31  ;;  %v3156_v34 = vpop.f32.mrb[10].mxu0 }
 0x7b5   : > { %v3157_v35 = vpop.f32.mrb[11].mxu0 }
 0x7b6   : > { %v2648_v36 = vadd.f32 %v3155_v33, %v3003_v0  ;;  %v2687_v37 = vpop.f32.mrb[36].mxu1 }
 0x7b7   : > { %v3226_v38 = vpop.f32.mrb[37].mxu1 }
 0x7b8   : > { %v2688_v40 = vadd.f32 %v2687_v37, %v2648_v36  ;;  %v2690_v41 = vpop.f32.mrb[38].mxu1 }
 0x7b9   : > { %v3227_v42 = vpop.f32.mrb[39].mxu1 }
 0x7ba   : > { %v3028_v43 = vmul.f32 -1.442695, %v2688_v40 }
 0x7bc   : > { %3488 = vpow2.f32 %v3028_v43 }
 0x7c6   : > { %v3489_v44 = vpop.eup %3488 }
 0x7c7   : > { %v2696_v45 = vadd.f32 1.0, %v3489_v44 }
 0x7c9   : > { %3490 = vrcp.f32 %v2696_v45 }
 0x7d3   : > { %v3491_v49 = vpop.eup %3490 }
 0x7d4   : > { %2699 = vst [vmem:[%s316_s17] sm:$0xff] %v3491_v49  ;;  %v2703_v50 = vmul.f32 %v3491_v49, %v2702_v48 }
 0x7d6   : > { %v2704_v51 = vmul.f32 %v2703_v50, %v2702_v48 }
 0x7d8   : > { %v2705_v52 = vrot.slane %v2704_v51, 4 }
 0x7da   : > { %v2706_v53 = vadd.f32 %v2705_v52, %v2704_v51 }
 0x7dc   : > { %v2707_v54 = vrot.slane %v2706_v53, 2 }
 0x7de   : > { %v2708_v55 = vadd.f32 %v2707_v54, %v2706_v53 }
 0x7e0   : > { %v2709_v56 = vrot.slane %v2708_v55, 1 }
 0x7e2   : > { %v2710_v57 = vadd.f32 %v2709_v56, %v2708_v55 }
 0x7e4   : > { %2711 = vst [vmem:[%s319_s20] sm:$0x1] %v2710_v57 }
 0x7e5 PF: > { %s18_s24 = sadd.s32 1, %s3500_s24  }
 0x7e6   : > { %p15_p4 = scmp.ge.s32.totalorder %s18_s24, 4  }
 0x7e8   :  { %17 = sbr.rel (!%p15_p4) target bundleno = 1 (0x1), region = 93 }

</bundles_post_ra>
